<compile_context>
chip_gen: v7x
topology: tpu7x:2x2x1
jax: 0.10.0
libtpu: 0.0.40
codegen_flags: <defaults>
</compile_context>

<pallas_src>
import numpy as np

import jax
import jax.numpy as jnp
from jax.experimental import pallas as pl
from jax.experimental.pallas import tpu as pltpu

EPS = 1e-5  # nn.BatchNorm2d default eps


# ----------------------------- fused Pallas kernel -------------------------

def _make_resnet_kernel(N, Ho, Wo, C, NCLS):
    """Build the fused forward kernel for static shapes."""
    Hp, Wp = Ho // 2, Wo // 2          # spatial size after 2x2 max-pool
    Pb = N * Hp * Wp                   # rows after pooling, (n, h, w) order
    HW = Hp * Wp
    K = 3

    def kernel(sp_ref, w1_ref, wb1_ref, wb2_ref, bn_ref, fcw_ref, fcb_ref,
               mask_ref, out_ref):

        def bn_maybe_relu(y, prow, relu):
            # training-mode BatchNorm (batch statistics), per-channel on lanes
            g = bn_ref[prow:prow + 1, :]
            b = bn_ref[prow + 1:prow + 2, :]
            mu = jnp.mean(y, axis=0, keepdims=True)
            var = jnp.mean((y - mu) ** 2, axis=0, keepdims=True)   # biased var
            y = (y - mu) * jax.lax.rsqrt(var + EPS) * g + b
            return jnp.maximum(y, 0.0) if relu else y

        def shift_rows(x, off):
            # out[r] = x[r + off] for in-range rows, 0 padding otherwise
            # (static slice + zero concat along the sublane axis).
            if off == 0:
                return x
            z = jnp.zeros((abs(off), C), jnp.float32)
            if off > 0:
                return jnp.concatenate([x[off:, :], z], axis=0)
            return jnp.concatenate([z, x[:Pb + off, :]], axis=0)

        def conv3x3(x, w_ref):
            # 3x3 / stride 1 / pad 1 conv of a (Pb, C) activation, rows in
            # (n, h, w) order.  Nine shifted taps, each masked at the image
            # boundary and contracted on the MXU, accumulated in f32.
            acc = jnp.zeros((Pb, C), jnp.float32)
            for dh in range(K):
                for dw in range(K):
                    t = dh * K + dw
                    off = (dh - 1) * Wp + (dw - 1)
                    tap = shift_rows(x, off) * mask_ref[t * Pb:(t + 1) * Pb, :]
                    acc = acc + jnp.dot(tap, w_ref[t * C:(t + 1) * C, :],
                                        preferred_element_type=jnp.float32)
            return acc

        # ---- stem: conv1 (im2col matmul on the MXU) + BN1 + ReLU ----------
        y = jnp.dot(sp_ref[...], w1_ref[...], preferred_element_type=jnp.float32)
        y = bn_maybe_relu(y, 0, True)                      # (4*Pb, C)

        # ---- 2x2 max pool: stem rows are grouped by pool tap, so the pool
        #      is an elementwise max of four contiguous row blocks.
        y0 = jnp.maximum(
            jnp.maximum(y[0 * Pb:1 * Pb, :], y[1 * Pb:2 * Pb, :]),
            jnp.maximum(y[2 * Pb:3 * Pb, :], y[3 * Pb:4 * Pb, :]))   # (Pb, C)

        # ---- residual block, entirely in VMEM (no HBM round trips) --------
        z = bn_maybe_relu(conv3x3(y0, wb1_ref), 2, True)
        z = bn_maybe_relu(conv3x3(z, wb2_ref), 4, False)
        z = jnp.maximum(z + y0, 0.0)                       # (Pb, C)

        # ---- adaptive avg pool (1,1) + fc, fused: one dot, one store ------
        pooled = jnp.concatenate(
            [jnp.mean(z[n * HW:(n + 1) * HW, :], axis=0, keepdims=True)
             for n in range(N)], axis=0)                   # (N, C)
        out_ref[...] = (jnp.dot(pooled, fcw_ref[...],
                                preferred_element_type=jnp.float32)
                        + fcb_ref[...])

    return kernel


# ------------------------------ JAX glue ------------------------------------

def _stem_patches(x_nhw, k=3, stride=2, pad=1):
    """im2col for the stem conv only (Cin=1), rows ordered (a, b, n, ip, jp)
    so that the in-kernel 2x2 max-pool is a max of 4 contiguous row blocks."""
    N, H, W = x_nhw.shape
    xp = jnp.pad(x_nhw, ((0, 0), (pad, pad), (pad, pad)))
    Ho = (H + 2 * pad - k) // stride + 1
    Wo = (W + 2 * pad - k) // stride + 1
    taps = []
    for dh in range(k):
        for dw in range(k):
            taps.append(xp[:, dh:dh + stride * (Ho - 1) + 1:stride,
                              dw:dw + stride * (Wo - 1) + 1:stride])  # (N,Ho,Wo)
    p = jnp.stack(taps, axis=-1)                       # (N, Ho, Wo, 9), cols (dh,dw)
    p = p.reshape(N, Ho // 2, 2, Wo // 2, 2, k * k)    # (n, ip, a, jp, b, t)
    p = jnp.transpose(p, (2, 4, 0, 1, 3, 5))           # (a, b, n, ip, jp, t)
    return p.reshape(N * Ho * Wo, k * k), Ho, Wo


def _tap_masks(N, Hp, Wp, C):
    """Validity masks (0/1) for the 9 shifted conv taps, rows (n, h, w)."""
    Pb = N * Hp * Wp
    r = np.arange(Pb)
    h = (r // Wp) % Hp
    w = r % Wp
    taps = []
    for dh in range(3):
        for dw in range(3):
            ok = ((h + dh - 1 >= 0) & (h + dh - 1 < Hp) &
                  (w + dw - 1 >= 0) & (w + dw - 1 < Wp)).astype(np.float32)
            taps.append(np.repeat(ok[:, None], C, axis=1))
    return np.concatenate(taps, axis=0)                # (9*Pb, C)


def conv_w_to_mat(w):
    """PyTorch conv weight (Cout, Cin, kh, kw) -> matmul weight (kh*kw*Cin, Cout)."""
    return jnp.transpose(w, (2, 3, 1, 0)).reshape(-1, w.shape[0])


def init_params(key, num_channels=4, num_classes=10):
    ks = jax.random.split(key, 5)
    C = num_channels
    return {
        "conv1_w": jax.random.normal(ks[0], (C, 1, 3, 3), jnp.float32) * 0.2,
        "bn1_g": jnp.ones((1, C), jnp.float32),
        "bn1_b": jnp.zeros((1, C), jnp.float32),
        "bconv1_w": jax.random.normal(ks[1], (C, C, 3, 3), jnp.float32) * 0.2,
        "bbn1_g": jnp.ones((1, C), jnp.float32),
        "bbn1_b": jnp.zeros((1, C), jnp.float32),
        "bconv2_w": jax.random.normal(ks[2], (C, C, 3, 3), jnp.float32) * 0.2,
        "bbn2_g": jnp.ones((1, C), jnp.float32),
        "bbn2_b": jnp.zeros((1, C), jnp.float32),
        "fc_w": jax.random.normal(ks[3], (num_classes, C), jnp.float32) * 0.2,
        "fc_b": jax.random.normal(ks[4], (num_classes,), jnp.float32) * 0.1,
    }


def prepare_params(p):
    """One-time parameter packing, hoisted out of the jitted forward."""
    return {
        "w1":  conv_w_to_mat(p["conv1_w"]),                 # (9, C)
        "wb1": conv_w_to_mat(p["bconv1_w"]),                # (9C, C)
        "wb2": conv_w_to_mat(p["bconv2_w"]),                # (9C, C)
        "bn":  jnp.concatenate([p["bn1_g"], p["bn1_b"],
                                p["bbn1_g"], p["bbn1_b"],
                                p["bbn2_g"], p["bbn2_b"]], axis=0),   # (6, C)
        "fc_w": jnp.transpose(p["fc_w"]),                   # (C, NCLS)
        "fc_b": p["fc_b"].reshape(1, -1),                   # (1, NCLS)
    }


@jax.jit
def resnet_forward(x_nchw, packed):
    """Pallas-backed forward. x_nchw: (N, 1, H, W) float32 -> (N, NCLS)."""
    x = x_nchw.astype(jnp.float32)[:, 0, :, :]              # (N, H, W), Cin = 1
    N, H, W = x.shape
    C = packed["w1"].shape[1]
    NCLS = packed["fc_w"].shape[1]

    sp, Ho, Wo = _stem_patches(x)                            # (N*Ho*Wo, 9)
    assert Ho % 2 == 0 and Wo % 2 == 0, "2x2 max-pool needs even conv1 output"
    Hp, Wp = Ho // 2, Wo // 2

    masks = jnp.asarray(_tap_masks(N, Hp, Wp, C))            # trace-time constant

    kernel = _make_resnet_kernel(N, Ho, Wo, C, NCLS)
    vmem = pltpu.MemorySpace.VMEM
    return pl.pallas_call(
        kernel,
        out_shape=jax.ShapeDtypeStruct((N, NCLS), jnp.float32),
        in_specs=[pl.BlockSpec(memory_space=vmem)] * 8,
        out_specs=pl.BlockSpec(memory_space=vmem),
    )(sp, packed["w1"], packed["wb1"], packed["wb2"],
      packed["bn"], packed["fc_w"], packed["fc_b"], masks)


# ----------------------- pure-JAX reference (sanity) ------------------------

def resnet_reference(x_nchw, p):
    x = jnp.transpose(x_nchw, (0, 2, 3, 1)).astype(jnp.float32)

    def conv(x, w, stride):
        return jax.lax.conv_general_dilated(
            x, jnp.transpose(w, (2, 3, 1, 0)), (stride, stride),
            ((1, 1), (1, 1)), dimension_numbers=("NHWC", "HWIO", "NHWC"))

    def bn(x, g, b):
        mu = jnp.mean(x, axis=(0, 1, 2), keepdims=True)
        var = jnp.mean((x - mu) ** 2, axis=(0, 1, 2), keepdims=True)
        return ((x - mu) * jax.lax.rsqrt(var + EPS) * g.reshape(1, 1, 1, -1)
                + b.reshape(1, 1, 1, -1))

    y = jax.nn.relu(bn(conv(x, p["conv1_w"], 2), p["bn1_g"], p["bn1_b"]))
    N, H, W, C = y.shape
    y = y.reshape(N, H // 2, 2, W // 2, 2, C).max(axis=(2, 4))
    r = y
    y = jax.nn.relu(bn(conv(y, p["bconv1_w"], 1), p["bbn1_g"], p["bbn1_b"]))
    y = bn(conv(y, p["bconv2_w"], 1), p["bbn2_g"], p["bbn2_b"])
    y = jax.nn.relu(y + r)
    y = jnp.mean(y, axis=(1, 2))
    return y @ p["fc_w"].T + p["fc_b"]


# --------------------------------- main --------------------------------------

if __name__ == "__main__":
    key = jax.random.PRNGKey(0)
    k_x, k_p = jax.random.split(key)

    N, C, H, W = 2, 4, 16, 16          # batch=2, num_channels=4, 16x16 images
    x = jax.random.normal(k_x, (N, 1, H, W), jnp.float32)
    params = init_params(k_p, num_channels=C, num_classes=10)
    packed = prepare_params(params)    # one-time weight packing (outside jit)

    out = resnet_forward(x, packed)
    out = jax.block_until_ready(out)

    ref = resnet_reference(x, params)
    assert out.shape == (N, 10)
    assert bool(jnp.all(jnp.isfinite(out)))
    assert bool(jnp.allclose(out, ref, atol=1e-2, rtol=1e-2))

    print("KERNEL_OK")
</pallas_src>

<mosaic_0001>
module attributes {stable_mosaic.version = 11 : i64} {
  func.func @kernel(%arg0: memref<128x9xf32, #tpu.memory_space<vmem>>, %arg1: memref<9x4xf32, #tpu.memory_space<vmem>>, %arg2: memref<36x4xf32, #tpu.memory_space<vmem>>, %arg3: memref<36x4xf32, #tpu.memory_space<vmem>>, %arg4: memref<6x4xf32, #tpu.memory_space<vmem>>, %arg5: memref<4x10xf32, #tpu.memory_space<vmem>>, %arg6: memref<1x10xf32, #tpu.memory_space<vmem>>, %arg7: memref<288x4xf32, #tpu.memory_space<vmem>>, %arg8: memref<2x10xf32, #tpu.memory_space<vmem>>) attributes {dimension_semantics = [], scalar_prefetch = 0 : i64, scratch_operands = 0 : i64, tpu.core_type = #tpu.core_type<tc>} {
    %c0 = arith.constant 0 : index
    %c0_0 = arith.constant 0 : index
    %0 = vector.load %arg0[%c0, %c0_0] : memref<128x9xf32, #tpu.memory_space<vmem>>, vector<128x9xf32>
    %c0_1 = arith.constant 0 : index
    %c0_2 = arith.constant 0 : index
    %1 = vector.load %arg1[%c0_1, %c0_2] : memref<9x4xf32, #tpu.memory_space<vmem>>, vector<9x4xf32>
    %cst = arith.constant dense<0.000000e+00> : vector<128x4xf32>
    %2 = tpu.matmul %0, %1, %cst {dimension_numbers = #tpu.dot_dimension_numbers<[1], [0], [0], [1], [0, 0, 1, 1], [], []>} : vector<128x9xf32>, vector<9x4xf32>, vector<128x4xf32> -> vector<128x4xf32>
    %c0_3 = arith.constant 0 : index
    %c0_4 = arith.constant 0 : index
    %3 = vector.load %arg4[%c0_3, %c0_4] : memref<6x4xf32, #tpu.memory_space<vmem>>, vector<1x4xf32>
    %c1 = arith.constant 1 : index
    %c0_5 = arith.constant 0 : index
    %4 = vector.load %arg4[%c1, %c0_5] : memref<6x4xf32, #tpu.memory_space<vmem>>, vector<1x4xf32>
    %cst_6 = arith.constant dense<0.000000e+00> : vector<4xf32>
    %5 = vector.multi_reduction <add>, %2, %cst_6 [0] : vector<128x4xf32> to vector<4xf32>
    %6 = vector.shape_cast %5 : vector<4xf32> to vector<1x4xf32>
    %cst_7 = arith.constant 1.280000e+02 : f32
    %7 = vector.broadcast %cst_7 : f32 to vector<1x4xf32>
    %8 = arith.divf %6, %7 : vector<1x4xf32>
    %9 = vector.broadcast %8 : vector<1x4xf32> to vector<128x4xf32>
    %10 = arith.subf %2, %9 : vector<128x4xf32>
    %11 = arith.mulf %10, %10 : vector<128x4xf32>
    %cst_8 = arith.constant dense<0.000000e+00> : vector<4xf32>
    %12 = vector.multi_reduction <add>, %11, %cst_8 [0] : vector<128x4xf32> to vector<4xf32>
    %13 = vector.shape_cast %12 : vector<4xf32> to vector<1x4xf32>
    %cst_9 = arith.constant 1.280000e+02 : f32
    %14 = vector.broadcast %cst_9 : f32 to vector<1x4xf32>
    %15 = arith.divf %13, %14 : vector<1x4xf32>
    %16 = vector.broadcast %8 : vector<1x4xf32> to vector<128x4xf32>
    %17 = arith.subf %2, %16 : vector<128x4xf32>
    %cst_10 = arith.constant 9.99999974E-6 : f32
    %18 = vector.broadcast %cst_10 : f32 to vector<1x4xf32>
    %19 = arith.addf %15, %18 : vector<1x4xf32>
    %20 = math.rsqrt %19 : vector<1x4xf32>
    %21 = vector.broadcast %20 : vector<1x4xf32> to vector<128x4xf32>
    %22 = arith.mulf %17, %21 : vector<128x4xf32>
    %23 = vector.broadcast %3 : vector<1x4xf32> to vector<128x4xf32>
    %24 = arith.mulf %22, %23 : vector<128x4xf32>
    %25 = vector.broadcast %4 : vector<1x4xf32> to vector<128x4xf32>
    %26 = arith.addf %24, %25 : vector<128x4xf32>
    %cst_11 = arith.constant 0.000000e+00 : f32
    %27 = vector.broadcast %cst_11 : f32 to vector<128x4xf32>
    %28 = arith.maximumf %26, %27 : vector<128x4xf32>
    %29 = vector.extract_strided_slice %28 {offsets = [0, 0], sizes = [32, 4], strides = [1, 1]} : vector<128x4xf32> to vector<32x4xf32>
    %30 = vector.extract_strided_slice %28 {offsets = [32, 0], sizes = [32, 4], strides = [1, 1]} : vector<128x4xf32> to vector<32x4xf32>
    %31 = arith.maximumf %29, %30 : vector<32x4xf32>
    %32 = vector.extract_strided_slice %28 {offsets = [64, 0], sizes = [32, 4], strides = [1, 1]} : vector<128x4xf32> to vector<32x4xf32>
    %33 = vector.extract_strided_slice %28 {offsets = [96, 0], sizes = [32, 4], strides = [1, 1]} : vector<128x4xf32> to vector<32x4xf32>
    %34 = arith.maximumf %32, %33 : vector<32x4xf32>
    %35 = arith.maximumf %31, %34 : vector<32x4xf32>
    %cst_12 = arith.constant 0.000000e+00 : f32
    %36 = vector.broadcast %cst_12 : f32 to vector<32x4xf32>
    %cst_13 = arith.constant 0.000000e+00 : f32
    %37 = vector.broadcast %cst_13 : f32 to vector<5x4xf32>
    %38 = vector.extract_strided_slice %35 {offsets = [0, 0], sizes = [27, 4], strides = [1, 1]} : vector<32x4xf32> to vector<27x4xf32>
    %39 = tpu.concatenate %37, %38 in 0 : vector<5x4xf32>, vector<27x4xf32> -> vector<32x4xf32>
    %c0_14 = arith.constant 0 : index
    %c0_15 = arith.constant 0 : index
    %40 = vector.load %arg7[%c0_14, %c0_15] : memref<288x4xf32, #tpu.memory_space<vmem>>, vector<32x4xf32>
    %41 = arith.mulf %39, %40 : vector<32x4xf32>
    %c0_16 = arith.constant 0 : index
    %c0_17 = arith.constant 0 : index
    %42 = vector.load %arg2[%c0_16, %c0_17] : memref<36x4xf32, #tpu.memory_space<vmem>>, vector<4x4xf32>
    %cst_18 = arith.constant dense<0.000000e+00> : vector<32x4xf32>
    %43 = tpu.matmul %41, %42, %cst_18 {dimension_numbers = #tpu.dot_dimension_numbers<[1], [0], [0], [1], [0, 0, 1, 1], [], []>} : vector<32x4xf32>, vector<4x4xf32>, vector<32x4xf32> -> vector<32x4xf32>
    %44 = arith.addf %36, %43 : vector<32x4xf32>
    %cst_19 = arith.constant 0.000000e+00 : f32
    %45 = vector.broadcast %cst_19 : f32 to vector<4x4xf32>
    %46 = vector.extract_strided_slice %35 {offsets = [0, 0], sizes = [28, 4], strides = [1, 1]} : vector<32x4xf32> to vector<28x4xf32>
    %47 = tpu.concatenate %45, %46 in 0 : vector<4x4xf32>, vector<28x4xf32> -> vector<32x4xf32>
    %c32 = arith.constant 32 : index
    %c0_20 = arith.constant 0 : index
    %48 = vector.load %arg7[%c32, %c0_20] : memref<288x4xf32, #tpu.memory_space<vmem>>, vector<32x4xf32>
    %49 = arith.mulf %47, %48 : vector<32x4xf32>
    %c4 = arith.constant 4 : index
    %c0_21 = arith.constant 0 : index
    %50 = vector.load %arg2[%c4, %c0_21] : memref<36x4xf32, #tpu.memory_space<vmem>>, vector<4x4xf32>
    %cst_22 = arith.constant dense<0.000000e+00> : vector<32x4xf32>
    %51 = tpu.matmul %49, %50, %cst_22 {dimension_numbers = #tpu.dot_dimension_numbers<[1], [0], [0], [1], [0, 0, 1, 1], [], []>} : vector<32x4xf32>, vector<4x4xf32>, vector<32x4xf32> -> vector<32x4xf32>
    %52 = arith.addf %44, %51 : vector<32x4xf32>
    %cst_23 = arith.constant 0.000000e+00 : f32
    %53 = vector.broadcast %cst_23 : f32 to vector<3x4xf32>
    %54 = vector.extract_strided_slice %35 {offsets = [0, 0], sizes = [29, 4], strides = [1, 1]} : vector<32x4xf32> to vector<29x4xf32>
    %55 = tpu.concatenate %53, %54 in 0 : vector<3x4xf32>, vector<29x4xf32> -> vector<32x4xf32>
    %c64 = arith.constant 64 : index
    %c0_24 = arith.constant 0 : index
    %56 = vector.load %arg7[%c64, %c0_24] : memref<288x4xf32, #tpu.memory_space<vmem>>, vector<32x4xf32>
    %57 = arith.mulf %55, %56 : vector<32x4xf32>
    %c8 = arith.constant 8 : index
    %c0_25 = arith.constant 0 : index
    %58 = vector.load %arg2[%c8, %c0_25] : memref<36x4xf32, #tpu.memory_space<vmem>>, vector<4x4xf32>
    %cst_26 = arith.constant dense<0.000000e+00> : vector<32x4xf32>
    %59 = tpu.matmul %57, %58, %cst_26 {dimension_numbers = #tpu.dot_dimension_numbers<[1], [0], [0], [1], [0, 0, 1, 1], [], []>} : vector<32x4xf32>, vector<4x4xf32>, vector<32x4xf32> -> vector<32x4xf32>
    %60 = arith.addf %52, %59 : vector<32x4xf32>
    %cst_27 = arith.constant 0.000000e+00 : f32
    %61 = vector.broadcast %cst_27 : f32 to vector<1x4xf32>
    %62 = vector.extract_strided_slice %35 {offsets = [0, 0], sizes = [31, 4], strides = [1, 1]} : vector<32x4xf32> to vector<31x4xf32>
    %63 = tpu.concatenate %61, %62 in 0 : vector<1x4xf32>, vector<31x4xf32> -> vector<32x4xf32>
    %c96 = arith.constant 96 : index
    %c0_28 = arith.constant 0 : index
    %64 = vector.load %arg7[%c96, %c0_28] : memref<288x4xf32, #tpu.memory_space<vmem>>, vector<32x4xf32>
    %65 = arith.mulf %63, %64 : vector<32x4xf32>
    %c12 = arith.constant 12 : index
    %c0_29 = arith.constant 0 : index
    %66 = vector.load %arg2[%c12, %c0_29] : memref<36x4xf32, #tpu.memory_space<vmem>>, vector<4x4xf32>
    %cst_30 = arith.constant dense<0.000000e+00> : vector<32x4xf32>
    %67 = tpu.matmul %65, %66, %cst_30 {dimension_numbers = #tpu.dot_dimension_numbers<[1], [0], [0], [1], [0, 0, 1, 1], [], []>} : vector<32x4xf32>, vector<4x4xf32>, vector<32x4xf32> -> vector<32x4xf32>
    %68 = arith.addf %60, %67 : vector<32x4xf32>
    %c128 = arith.constant 128 : index
    %c0_31 = arith.constant 0 : index
    %69 = vector.load %arg7[%c128, %c0_31] : memref<288x4xf32, #tpu.memory_space<vmem>>, vector<32x4xf32>
    %70 = arith.mulf %35, %69 : vector<32x4xf32>
    %c16 = arith.constant 16 : index
    %c0_32 = arith.constant 0 : index
    %71 = vector.load %arg2[%c16, %c0_32] : memref<36x4xf32, #tpu.memory_space<vmem>>, vector<4x4xf32>
    %cst_33 = arith.constant dense<0.000000e+00> : vector<32x4xf32>
    %72 = tpu.matmul %70, %71, %cst_33 {dimension_numbers = #tpu.dot_dimension_numbers<[1], [0], [0], [1], [0, 0, 1, 1], [], []>} : vector<32x4xf32>, vector<4x4xf32>, vector<32x4xf32> -> vector<32x4xf32>
    %73 = arith.addf %68, %72 : vector<32x4xf32>
    %cst_34 = arith.constant 0.000000e+00 : f32
    %74 = vector.broadcast %cst_34 : f32 to vector<1x4xf32>
    %75 = vector.extract_strided_slice %35 {offsets = [1, 0], sizes = [31, 4], strides = [1, 1]} : vector<32x4xf32> to vector<31x4xf32>
    %76 = tpu.concatenate %75, %74 in 0 : vector<31x4xf32>, vector<1x4xf32> -> vector<32x4xf32>
    %c160 = arith.constant 160 : index
    %c0_35 = arith.constant 0 : index
    %77 = vector.load %arg7[%c160, %c0_35] : memref<288x4xf32, #tpu.memory_space<vmem>>, vector<32x4xf32>
    %78 = arith.mulf %76, %77 : vector<32x4xf32>
    %c20 = arith.constant 20 : index
    %c0_36 = arith.constant 0 : index
    %79 = vector.load %arg2[%c20, %c0_36] : memref<36x4xf32, #tpu.memory_space<vmem>>, vector<4x4xf32>
    %cst_37 = arith.constant dense<0.000000e+00> : vector<32x4xf32>
    %80 = tpu.matmul %78, %79, %cst_37 {dimension_numbers = #tpu.dot_dimension_numbers<[1], [0], [0], [1], [0, 0, 1, 1], [], []>} : vector<32x4xf32>, vector<4x4xf32>, vector<32x4xf32> -> vector<32x4xf32>
    %81 = arith.addf %73, %80 : vector<32x4xf32>
    %cst_38 = arith.constant 0.000000e+00 : f32
    %82 = vector.broadcast %cst_38 : f32 to vector<3x4xf32>
    %83 = vector.extract_strided_slice %35 {offsets = [3, 0], sizes = [29, 4], strides = [1, 1]} : vector<32x4xf32> to vector<29x4xf32>
    %84 = tpu.concatenate %83, %82 in 0 : vector<29x4xf32>, vector<3x4xf32> -> vector<32x4xf32>
    %c192 = arith.constant 192 : index
    %c0_39 = arith.constant 0 : index
    %85 = vector.load %arg7[%c192, %c0_39] : memref<288x4xf32, #tpu.memory_space<vmem>>, vector<32x4xf32>
    %86 = arith.mulf %84, %85 : vector<32x4xf32>
    %c24 = arith.constant 24 : index
    %c0_40 = arith.constant 0 : index
    %87 = vector.load %arg2[%c24, %c0_40] : memref<36x4xf32, #tpu.memory_space<vmem>>, vector<4x4xf32>
    %cst_41 = arith.constant dense<0.000000e+00> : vector<32x4xf32>
    %88 = tpu.matmul %86, %87, %cst_41 {dimension_numbers = #tpu.dot_dimension_numbers<[1], [0], [0], [1], [0, 0, 1, 1], [], []>} : vector<32x4xf32>, vector<4x4xf32>, vector<32x4xf32> -> vector<32x4xf32>
    %89 = arith.addf %81, %88 : vector<32x4xf32>
    %cst_42 = arith.constant 0.000000e+00 : f32
    %90 = vector.broadcast %cst_42 : f32 to vector<4x4xf32>
    %91 = vector.extract_strided_slice %35 {offsets = [4, 0], sizes = [28, 4], strides = [1, 1]} : vector<32x4xf32> to vector<28x4xf32>
    %92 = tpu.concatenate %91, %90 in 0 : vector<28x4xf32>, vector<4x4xf32> -> vector<32x4xf32>
    %c224 = arith.constant 224 : index
    %c0_43 = arith.constant 0 : index
    %93 = vector.load %arg7[%c224, %c0_43] : memref<288x4xf32, #tpu.memory_space<vmem>>, vector<32x4xf32>
    %94 = arith.mulf %92, %93 : vector<32x4xf32>
    %c28 = arith.constant 28 : index
    %c0_44 = arith.constant 0 : index
    %95 = vector.load %arg2[%c28, %c0_44] : memref<36x4xf32, #tpu.memory_space<vmem>>, vector<4x4xf32>
    %cst_45 = arith.constant dense<0.000000e+00> : vector<32x4xf32>
    %96 = tpu.matmul %94, %95, %cst_45 {dimension_numbers = #tpu.dot_dimension_numbers<[1], [0], [0], [1], [0, 0, 1, 1], [], []>} : vector<32x4xf32>, vector<4x4xf32>, vector<32x4xf32> -> vector<32x4xf32>
    %97 = arith.addf %89, %96 : vector<32x4xf32>
    %cst_46 = arith.constant 0.000000e+00 : f32
    %98 = vector.broadcast %cst_46 : f32 to vector<5x4xf32>
    %99 = vector.extract_strided_slice %35 {offsets = [5, 0], sizes = [27, 4], strides = [1, 1]} : vector<32x4xf32> to vector<27x4xf32>
    %100 = tpu.concatenate %99, %98 in 0 : vector<27x4xf32>, vector<5x4xf32> -> vector<32x4xf32>
    %c256 = arith.constant 256 : index
    %c0_47 = arith.constant 0 : index
    %101 = vector.load %arg7[%c256, %c0_47] : memref<288x4xf32, #tpu.memory_space<vmem>>, vector<32x4xf32>
    %102 = arith.mulf %100, %101 : vector<32x4xf32>
    %c32_48 = arith.constant 32 : index
    %c0_49 = arith.constant 0 : index
    %103 = vector.load %arg2[%c32_48, %c0_49] : memref<36x4xf32, #tpu.memory_space<vmem>>, vector<4x4xf32>
    %cst_50 = arith.constant dense<0.000000e+00> : vector<32x4xf32>
    %104 = tpu.matmul %102, %103, %cst_50 {dimension_numbers = #tpu.dot_dimension_numbers<[1], [0], [0], [1], [0, 0, 1, 1], [], []>} : vector<32x4xf32>, vector<4x4xf32>, vector<32x4xf32> -> vector<32x4xf32>
    %105 = arith.addf %97, %104 : vector<32x4xf32>
    %c2 = arith.constant 2 : index
    %c0_51 = arith.constant 0 : index
    %106 = vector.load %arg4[%c2, %c0_51] : memref<6x4xf32, #tpu.memory_space<vmem>>, vector<1x4xf32>
    %c3 = arith.constant 3 : index
    %c0_52 = arith.constant 0 : index
    %107 = vector.load %arg4[%c3, %c0_52] : memref<6x4xf32, #tpu.memory_space<vmem>>, vector<1x4xf32>
    %cst_53 = arith.constant dense<0.000000e+00> : vector<4xf32>
    %108 = vector.multi_reduction <add>, %105, %cst_53 [0] : vector<32x4xf32> to vector<4xf32>
    %109 = vector.shape_cast %108 : vector<4xf32> to vector<1x4xf32>
    %cst_54 = arith.constant 3.200000e+01 : f32
    %110 = vector.broadcast %cst_54 : f32 to vector<1x4xf32>
    %111 = arith.divf %109, %110 : vector<1x4xf32>
    %112 = vector.broadcast %111 : vector<1x4xf32> to vector<32x4xf32>
    %113 = arith.subf %105, %112 : vector<32x4xf32>
    %114 = arith.mulf %113, %113 : vector<32x4xf32>
    %cst_55 = arith.constant dense<0.000000e+00> : vector<4xf32>
    %115 = vector.multi_reduction <add>, %114, %cst_55 [0] : vector<32x4xf32> to vector<4xf32>
    %116 = vector.shape_cast %115 : vector<4xf32> to vector<1x4xf32>
    %cst_56 = arith.constant 3.200000e+01 : f32
    %117 = vector.broadcast %cst_56 : f32 to vector<1x4xf32>
    %118 = arith.divf %116, %117 : vector<1x4xf32>
    %119 = vector.broadcast %111 : vector<1x4xf32> to vector<32x4xf32>
    %120 = arith.subf %105, %119 : vector<32x4xf32>
    %cst_57 = arith.constant 9.99999974E-6 : f32
    %121 = vector.broadcast %cst_57 : f32 to vector<1x4xf32>
    %122 = arith.addf %118, %121 : vector<1x4xf32>
    %123 = math.rsqrt %122 : vector<1x4xf32>
    %124 = vector.broadcast %123 : vector<1x4xf32> to vector<32x4xf32>
    %125 = arith.mulf %120, %124 : vector<32x4xf32>
    %126 = vector.broadcast %106 : vector<1x4xf32> to vector<32x4xf32>
    %127 = arith.mulf %125, %126 : vector<32x4xf32>
    %128 = vector.broadcast %107 : vector<1x4xf32> to vector<32x4xf32>
    %129 = arith.addf %127, %128 : vector<32x4xf32>
    %cst_58 = arith.constant 0.000000e+00 : f32
    %130 = vector.broadcast %cst_58 : f32 to vector<32x4xf32>
    %131 = arith.maximumf %129, %130 : vector<32x4xf32>
    %cst_59 = arith.constant 0.000000e+00 : f32
    %132 = vector.broadcast %cst_59 : f32 to vector<32x4xf32>
    %cst_60 = arith.constant 0.000000e+00 : f32
    %133 = vector.broadcast %cst_60 : f32 to vector<5x4xf32>
    %134 = vector.extract_strided_slice %131 {offsets = [0, 0], sizes = [27, 4], strides = [1, 1]} : vector<32x4xf32> to vector<27x4xf32>
    %135 = tpu.concatenate %133, %134 in 0 : vector<5x4xf32>, vector<27x4xf32> -> vector<32x4xf32>
    %c0_61 = arith.constant 0 : index
    %c0_62 = arith.constant 0 : index
    %136 = vector.load %arg7[%c0_61, %c0_62] : memref<288x4xf32, #tpu.memory_space<vmem>>, vector<32x4xf32>
    %137 = arith.mulf %135, %136 : vector<32x4xf32>
    %c0_63 = arith.constant 0 : index
    %c0_64 = arith.constant 0 : index
    %138 = vector.load %arg3[%c0_63, %c0_64] : memref<36x4xf32, #tpu.memory_space<vmem>>, vector<4x4xf32>
    %cst_65 = arith.constant dense<0.000000e+00> : vector<32x4xf32>
    %139 = tpu.matmul %137, %138, %cst_65 {dimension_numbers = #tpu.dot_dimension_numbers<[1], [0], [0], [1], [0, 0, 1, 1], [], []>} : vector<32x4xf32>, vector<4x4xf32>, vector<32x4xf32> -> vector<32x4xf32>
    %140 = arith.addf %132, %139 : vector<32x4xf32>
    %cst_66 = arith.constant 0.000000e+00 : f32
    %141 = vector.broadcast %cst_66 : f32 to vector<4x4xf32>
    %142 = vector.extract_strided_slice %131 {offsets = [0, 0], sizes = [28, 4], strides = [1, 1]} : vector<32x4xf32> to vector<28x4xf32>
    %143 = tpu.concatenate %141, %142 in 0 : vector<4x4xf32>, vector<28x4xf32> -> vector<32x4xf32>
    %c32_67 = arith.constant 32 : index
    %c0_68 = arith.constant 0 : index
    %144 = vector.load %arg7[%c32_67, %c0_68] : memref<288x4xf32, #tpu.memory_space<vmem>>, vector<32x4xf32>
    %145 = arith.mulf %143, %144 : vector<32x4xf32>
    %c4_69 = arith.constant 4 : index
    %c0_70 = arith.constant 0 : index
    %146 = vector.load %arg3[%c4_69, %c0_70] : memref<36x4xf32, #tpu.memory_space<vmem>>, vector<4x4xf32>
    %cst_71 = arith.constant dense<0.000000e+00> : vector<32x4xf32>
    %147 = tpu.matmul %145, %146, %cst_71 {dimension_numbers = #tpu.dot_dimension_numbers<[1], [0], [0], [1], [0, 0, 1, 1], [], []>} : vector<32x4xf32>, vector<4x4xf32>, vector<32x4xf32> -> vector<32x4xf32>
    %148 = arith.addf %140, %147 : vector<32x4xf32>
    %cst_72 = arith.constant 0.000000e+00 : f32
    %149 = vector.broadcast %cst_72 : f32 to vector<3x4xf32>
    %150 = vector.extract_strided_slice %131 {offsets = [0, 0], sizes = [29, 4], strides = [1, 1]} : vector<32x4xf32> to vector<29x4xf32>
    %151 = tpu.concatenate %149, %150 in 0 : vector<3x4xf32>, vector<29x4xf32> -> vector<32x4xf32>
    %c64_73 = arith.constant 64 : index
    %c0_74 = arith.constant 0 : index
    %152 = vector.load %arg7[%c64_73, %c0_74] : memref<288x4xf32, #tpu.memory_space<vmem>>, vector<32x4xf32>
    %153 = arith.mulf %151, %152 : vector<32x4xf32>
    %c8_75 = arith.constant 8 : index
    %c0_76 = arith.constant 0 : index
    %154 = vector.load %arg3[%c8_75, %c0_76] : memref<36x4xf32, #tpu.memory_space<vmem>>, vector<4x4xf32>
    %cst_77 = arith.constant dense<0.000000e+00> : vector<32x4xf32>
    %155 = tpu.matmul %153, %154, %cst_77 {dimension_numbers = #tpu.dot_dimension_numbers<[1], [0], [0], [1], [0, 0, 1, 1], [], []>} : vector<32x4xf32>, vector<4x4xf32>, vector<32x4xf32> -> vector<32x4xf32>
    %156 = arith.addf %148, %155 : vector<32x4xf32>
    %cst_78 = arith.constant 0.000000e+00 : f32
    %157 = vector.broadcast %cst_78 : f32 to vector<1x4xf32>
    %158 = vector.extract_strided_slice %131 {offsets = [0, 0], sizes = [31, 4], strides = [1, 1]} : vector<32x4xf32> to vector<31x4xf32>
    %159 = tpu.concatenate %157, %158 in 0 : vector<1x4xf32>, vector<31x4xf32> -> vector<32x4xf32>
    %c96_79 = arith.constant 96 : index
    %c0_80 = arith.constant 0 : index
    %160 = vector.load %arg7[%c96_79, %c0_80] : memref<288x4xf32, #tpu.memory_space<vmem>>, vector<32x4xf32>
    %161 = arith.mulf %159, %160 : vector<32x4xf32>
    %c12_81 = arith.constant 12 : index
    %c0_82 = arith.constant 0 : index
    %162 = vector.load %arg3[%c12_81, %c0_82] : memref<36x4xf32, #tpu.memory_space<vmem>>, vector<4x4xf32>
    %cst_83 = arith.constant dense<0.000000e+00> : vector<32x4xf32>
    %163 = tpu.matmul %161, %162, %cst_83 {dimension_numbers = #tpu.dot_dimension_numbers<[1], [0], [0], [1], [0, 0, 1, 1], [], []>} : vector<32x4xf32>, vector<4x4xf32>, vector<32x4xf32> -> vector<32x4xf32>
    %164 = arith.addf %156, %163 : vector<32x4xf32>
    %c128_84 = arith.constant 128 : index
    %c0_85 = arith.constant 0 : index
    %165 = vector.load %arg7[%c128_84, %c0_85] : memref<288x4xf32, #tpu.memory_space<vmem>>, vector<32x4xf32>
    %166 = arith.mulf %131, %165 : vector<32x4xf32>
    %c16_86 = arith.constant 16 : index
    %c0_87 = arith.constant 0 : index
    %167 = vector.load %arg3[%c16_86, %c0_87] : memref<36x4xf32, #tpu.memory_space<vmem>>, vector<4x4xf32>
    %cst_88 = arith.constant dense<0.000000e+00> : vector<32x4xf32>
    %168 = tpu.matmul %166, %167, %cst_88 {dimension_numbers = #tpu.dot_dimension_numbers<[1], [0], [0], [1], [0, 0, 1, 1], [], []>} : vector<32x4xf32>, vector<4x4xf32>, vector<32x4xf32> -> vector<32x4xf32>
    %169 = arith.addf %164, %168 : vector<32x4xf32>
    %cst_89 = arith.constant 0.000000e+00 : f32
    %170 = vector.broadcast %cst_89 : f32 to vector<1x4xf32>
    %171 = vector.extract_strided_slice %131 {offsets = [1, 0], sizes = [31, 4], strides = [1, 1]} : vector<32x4xf32> to vector<31x4xf32>
    %172 = tpu.concatenate %171, %170 in 0 : vector<31x4xf32>, vector<1x4xf32> -> vector<32x4xf32>
    %c160_90 = arith.constant 160 : index
    %c0_91 = arith.constant 0 : index
    %173 = vector.load %arg7[%c160_90, %c0_91] : memref<288x4xf32, #tpu.memory_space<vmem>>, vector<32x4xf32>
    %174 = arith.mulf %172, %173 : vector<32x4xf32>
    %c20_92 = arith.constant 20 : index
    %c0_93 = arith.constant 0 : index
    %175 = vector.load %arg3[%c20_92, %c0_93] : memref<36x4xf32, #tpu.memory_space<vmem>>, vector<4x4xf32>
    %cst_94 = arith.constant dense<0.000000e+00> : vector<32x4xf32>
    %176 = tpu.matmul %174, %175, %cst_94 {dimension_numbers = #tpu.dot_dimension_numbers<[1], [0], [0], [1], [0, 0, 1, 1], [], []>} : vector<32x4xf32>, vector<4x4xf32>, vector<32x4xf32> -> vector<32x4xf32>
    %177 = arith.addf %169, %176 : vector<32x4xf32>
    %cst_95 = arith.constant 0.000000e+00 : f32
    %178 = vector.broadcast %cst_95 : f32 to vector<3x4xf32>
    %179 = vector.extract_strided_slice %131 {offsets = [3, 0], sizes = [29, 4], strides = [1, 1]} : vector<32x4xf32> to vector<29x4xf32>
    %180 = tpu.concatenate %179, %178 in 0 : vector<29x4xf32>, vector<3x4xf32> -> vector<32x4xf32>
    %c192_96 = arith.constant 192 : index
    %c0_97 = arith.constant 0 : index
    %181 = vector.load %arg7[%c192_96, %c0_97] : memref<288x4xf32, #tpu.memory_space<vmem>>, vector<32x4xf32>
    %182 = arith.mulf %180, %181 : vector<32x4xf32>
    %c24_98 = arith.constant 24 : index
    %c0_99 = arith.constant 0 : index
    %183 = vector.load %arg3[%c24_98, %c0_99] : memref<36x4xf32, #tpu.memory_space<vmem>>, vector<4x4xf32>
    %cst_100 = arith.constant dense<0.000000e+00> : vector<32x4xf32>
    %184 = tpu.matmul %182, %183, %cst_100 {dimension_numbers = #tpu.dot_dimension_numbers<[1], [0], [0], [1], [0, 0, 1, 1], [], []>} : vector<32x4xf32>, vector<4x4xf32>, vector<32x4xf32> -> vector<32x4xf32>
    %185 = arith.addf %177, %184 : vector<32x4xf32>
    %cst_101 = arith.constant 0.000000e+00 : f32
    %186 = vector.broadcast %cst_101 : f32 to vector<4x4xf32>
    %187 = vector.extract_strided_slice %131 {offsets = [4, 0], sizes = [28, 4], strides = [1, 1]} : vector<32x4xf32> to vector<28x4xf32>
    %188 = tpu.concatenate %187, %186 in 0 : vector<28x4xf32>, vector<4x4xf32> -> vector<32x4xf32>
    %c224_102 = arith.constant 224 : index
    %c0_103 = arith.constant 0 : index
    %189 = vector.load %arg7[%c224_102, %c0_103] : memref<288x4xf32, #tpu.memory_space<vmem>>, vector<32x4xf32>
    %190 = arith.mulf %188, %189 : vector<32x4xf32>
    %c28_104 = arith.constant 28 : index
    %c0_105 = arith.constant 0 : index
    %191 = vector.load %arg3[%c28_104, %c0_105] : memref<36x4xf32, #tpu.memory_space<vmem>>, vector<4x4xf32>
    %cst_106 = arith.constant dense<0.000000e+00> : vector<32x4xf32>
    %192 = tpu.matmul %190, %191, %cst_106 {dimension_numbers = #tpu.dot_dimension_numbers<[1], [0], [0], [1], [0, 0, 1, 1], [], []>} : vector<32x4xf32>, vector<4x4xf32>, vector<32x4xf32> -> vector<32x4xf32>
    %193 = arith.addf %185, %192 : vector<32x4xf32>
    %cst_107 = arith.constant 0.000000e+00 : f32
    %194 = vector.broadcast %cst_107 : f32 to vector<5x4xf32>
    %195 = vector.extract_strided_slice %131 {offsets = [5, 0], sizes = [27, 4], strides = [1, 1]} : vector<32x4xf32> to vector<27x4xf32>
    %196 = tpu.concatenate %195, %194 in 0 : vector<27x4xf32>, vector<5x4xf32> -> vector<32x4xf32>
    %c256_108 = arith.constant 256 : index
    %c0_109 = arith.constant 0 : index
    %197 = vector.load %arg7[%c256_108, %c0_109] : memref<288x4xf32, #tpu.memory_space<vmem>>, vector<32x4xf32>
    %198 = arith.mulf %196, %197 : vector<32x4xf32>
    %c32_110 = arith.constant 32 : index
    %c0_111 = arith.constant 0 : index
    %199 = vector.load %arg3[%c32_110, %c0_111] : memref<36x4xf32, #tpu.memory_space<vmem>>, vector<4x4xf32>
    %cst_112 = arith.constant dense<0.000000e+00> : vector<32x4xf32>
    %200 = tpu.matmul %198, %199, %cst_112 {dimension_numbers = #tpu.dot_dimension_numbers<[1], [0], [0], [1], [0, 0, 1, 1], [], []>} : vector<32x4xf32>, vector<4x4xf32>, vector<32x4xf32> -> vector<32x4xf32>
    %201 = arith.addf %193, %200 : vector<32x4xf32>
    %c4_113 = arith.constant 4 : index
    %c0_114 = arith.constant 0 : index
    %202 = vector.load %arg4[%c4_113, %c0_114] : memref<6x4xf32, #tpu.memory_space<vmem>>, vector<1x4xf32>
    %c5 = arith.constant 5 : index
    %c0_115 = arith.constant 0 : index
    %203 = vector.load %arg4[%c5, %c0_115] : memref<6x4xf32, #tpu.memory_space<vmem>>, vector<1x4xf32>
    %cst_116 = arith.constant dense<0.000000e+00> : vector<4xf32>
    %204 = vector.multi_reduction <add>, %201, %cst_116 [0] : vector<32x4xf32> to vector<4xf32>
    %205 = vector.shape_cast %204 : vector<4xf32> to vector<1x4xf32>
    %cst_117 = arith.constant 3.200000e+01 : f32
    %206 = vector.broadcast %cst_117 : f32 to vector<1x4xf32>
    %207 = arith.divf %205, %206 : vector<1x4xf32>
    %208 = vector.broadcast %207 : vector<1x4xf32> to vector<32x4xf32>
    %209 = arith.subf %201, %208 : vector<32x4xf32>
    %210 = arith.mulf %209, %209 : vector<32x4xf32>
    %cst_118 = arith.constant dense<0.000000e+00> : vector<4xf32>
    %211 = vector.multi_reduction <add>, %210, %cst_118 [0] : vector<32x4xf32> to vector<4xf32>
    %212 = vector.shape_cast %211 : vector<4xf32> to vector<1x4xf32>
    %cst_119 = arith.constant 3.200000e+01 : f32
    %213 = vector.broadcast %cst_119 : f32 to vector<1x4xf32>
    %214 = arith.divf %212, %213 : vector<1x4xf32>
    %215 = vector.broadcast %207 : vector<1x4xf32> to vector<32x4xf32>
    %216 = arith.subf %201, %215 : vector<32x4xf32>
    %cst_120 = arith.constant 9.99999974E-6 : f32
    %217 = vector.broadcast %cst_120 : f32 to vector<1x4xf32>
    %218 = arith.addf %214, %217 : vector<1x4xf32>
    %219 = math.rsqrt %218 : vector<1x4xf32>
    %220 = vector.broadcast %219 : vector<1x4xf32> to vector<32x4xf32>
    %221 = arith.mulf %216, %220 : vector<32x4xf32>
    %222 = vector.broadcast %202 : vector<1x4xf32> to vector<32x4xf32>
    %223 = arith.mulf %221, %222 : vector<32x4xf32>
    %224 = vector.broadcast %203 : vector<1x4xf32> to vector<32x4xf32>
    %225 = arith.addf %223, %224 : vector<32x4xf32>
    %226 = arith.addf %225, %35 : vector<32x4xf32>
    %cst_121 = arith.constant 0.000000e+00 : f32
    %227 = vector.broadcast %cst_121 : f32 to vector<32x4xf32>
    %228 = arith.maximumf %226, %227 : vector<32x4xf32>
    %229 = vector.extract_strided_slice %228 {offsets = [0, 0], sizes = [16, 4], strides = [1, 1]} : vector<32x4xf32> to vector<16x4xf32>
    %cst_122 = arith.constant dense<0.000000e+00> : vector<4xf32>
    %230 = vector.multi_reduction <add>, %229, %cst_122 [0] : vector<16x4xf32> to vector<4xf32>
    %231 = vector.shape_cast %230 : vector<4xf32> to vector<1x4xf32>
    %cst_123 = arith.constant 1.600000e+01 : f32
    %232 = vector.broadcast %cst_123 : f32 to vector<1x4xf32>
    %233 = arith.divf %231, %232 : vector<1x4xf32>
    %234 = vector.extract_strided_slice %228 {offsets = [16, 0], sizes = [16, 4], strides = [1, 1]} : vector<32x4xf32> to vector<16x4xf32>
    %cst_124 = arith.constant dense<0.000000e+00> : vector<4xf32>
    %235 = vector.multi_reduction <add>, %234, %cst_124 [0] : vector<16x4xf32> to vector<4xf32>
    %236 = vector.shape_cast %235 : vector<4xf32> to vector<1x4xf32>
    %cst_125 = arith.constant 1.600000e+01 : f32
    %237 = vector.broadcast %cst_125 : f32 to vector<1x4xf32>
    %238 = arith.divf %236, %237 : vector<1x4xf32>
    %239 = tpu.concatenate %233, %238 in 0 : vector<1x4xf32>, vector<1x4xf32> -> vector<2x4xf32>
    %c0_126 = arith.constant 0 : index
    %c0_127 = arith.constant 0 : index
    %240 = vector.load %arg5[%c0_126, %c0_127] : memref<4x10xf32, #tpu.memory_space<vmem>>, vector<4x10xf32>
    %cst_128 = arith.constant dense<0.000000e+00> : vector<2x10xf32>
    %241 = tpu.matmul %239, %240, %cst_128 {dimension_numbers = #tpu.dot_dimension_numbers<[1], [0], [0], [1], [0, 0, 1, 1], [], []>} : vector<2x4xf32>, vector<4x10xf32>, vector<2x10xf32> -> vector<2x10xf32>
    %c0_129 = arith.constant 0 : index
    %c0_130 = arith.constant 0 : index
    %242 = vector.load %arg6[%c0_129, %c0_130] : memref<1x10xf32, #tpu.memory_space<vmem>>, vector<1x10xf32>
    %243 = vector.broadcast %242 : vector<1x10xf32> to vector<2x10xf32>
    %244 = arith.addf %241, %243 : vector<2x10xf32>
    %c0_131 = arith.constant 0 : index
    %c0_132 = arith.constant 0 : index
    %245 = vector.load %arg8[%c0_131, %c0_132] : memref<2x10xf32, #tpu.memory_space<vmem>>, vector<2x10xf32>
    tpu.vector_store %arg8[%c0_131, %c0_132], %244 {strides = array<i32>} : memref<2x10xf32, #tpu.memory_space<vmem>>, vector<2x10xf32>,
    return
  }
}

</mosaic_0001>

<bundles_post_ra>
// kernel: resnet_forward.1
= control target key start
LH: loop header
LB: loop body
LE: loop exit
PB: predicated region body
PF: predicated region fallthrough
CT: control target
= control target key end

     0   :  { %vm97_vm0 = vcmask 1040384   ;;  %vm3334_vm1 = vmmov 1   ;;  %vm48_vm3 = vcmask 72704   ;;  %s4269_s0 = inlined_call_operand.vmem [shape: f32[128,9], index: 0, kind: input, shape index: {}]   ;;  %s4270_s1 = inlined_call_operand.vmem [shape: f32[9,4], index: 1, kind: input, shape index: {}]   ;;  %s4271_s2 = inlined_call_operand.vmem [shape: f32[36,4], index: 2, kind: input, shape index: {}]   ;;  %s4272_s3 = inlined_call_operand.vmem [shape: f32[36,4], index: 3, kind: input, shape index: {}]   ;;  %s4273_s4 = inlined_call_operand.vmem [shape: f32[6,4], index: 4, kind: input, shape index: {}]   ;;  %s4274_s5 = inlined_call_operand.vmem [shape: f32[4,10], index: 5, kind: input, shape index: {}]   ;;  %s4275_s6 = inlined_call_operand.vmem [shape: f32[1,10], index: 6, kind: input, shape index: {}]   ;;  %s4276_s7 = inlined_call_operand.vmem [shape: f32[288,4], index: 7, kind: input, shape index: {}]   ;;  %s4277_s8 = inlined_call_operand.hbm [shape: f32[2,10], index: 8, kind: output, shape index: {}]  }
   0x1   :  { %v46_v0 = vld [vmem:[%s4270_s1] sm:$0xff]  ;;  %v47_v1 = vld [vmem:[%s4270_s1 + $0x8] sm:$0x1]  ;;  %vm3229_vm2 = vmpackc.low %vm97_vm0, %vm3334_vm1 }
   0x2   :  { %v30_v2 = vld [vmem:[%s4269_s0] sm:$0xff]  ;;  %v3228_v3 = vpack.c.bf16 %v47_v1, %v46_v0  ;;  %v31_v4 = vld [vmem:[%s4269_s0 + $0x8] sm:$0xff]  ;;  %v40_v5 = vld [vmem:[%s4269_s0 + $0x50] sm:$0xff] }
   0x3   :  { %3055 = vmatprep.mubr.msk.f32.mxu0 %vm48_vm3, %v30_v2  ;;  %v41_v6 = vld [vmem:[%s4269_s0 + $0x58] sm:$0xff]  ;;  %v32_v7 = vld [vmem:[%s4269_s0 + $0x10] sm:$0xff]  ;;  %3070 = vmatprep.mubr.msk.f32.mxu1 %vm48_vm3, %v40_v5  ;;  %v42_v8 = vld [vmem:[%s4269_s0 + $0x60] sm:$0xff] }
   0x4   :  { %3230 = vmatprep.subr.msk.bf16.mxu0 %vm3229_vm2, %v3228_v3  ;;  %3234 = vmatprep.subr.msk.bf16.mxu1 %vm3229_vm2, %v3228_v3 }
   0x5   :  { %3233 = vmatpush3.bf16.msk.msra.mxu0 %vm3229_vm2, %v3228_v3  ;;  %3235 = vmatpush3.bf16.msk.msra.mxu1 %vm3229_vm2, %v3228_v3 }
   0x6   :  { %13 = vsyncpa [#allocation3], 0  ;;  %v33_v9 = vld [vmem:[%s4269_s0 + $0x18] sm:$0xff]  ;;  %v43_v10 = vld [vmem:[%s4269_s0 + $0x68] sm:$0xff]  ;;  %vm248_vm4 = vcmask 31744   ;;  %vm470_vm5 = vcmask 1043456  }
   0x7   :  { %v34_v11 = vld [vmem:[%s4269_s0 + $0x20] sm:$0xff]  ;;  %v44_v12 = vld [vmem:[%s4269_s0 + $0x70] sm:$0xff]  ;;  %v35_v13 = vld [vmem:[%s4269_s0 + $0x28] sm:$0xff]  ;;  %vm448_vm6 = vcmask 1044480   ;;  %vm692_vm7 = vcmask 1042432   ;;  %vm1056_vm8 = vcmask 1046528  }
   0x8   :  { %3056 = vmatmul.mubr.msk.f32.vlgmr.msra.gmra.mrb[0].mxu0 %vm48_vm3, %v31_v4  ;;  %3071 = vmatmul.mubr.msk.f32.vlgmr.msra.gmra.mrb[0].mxu1 %vm48_vm3, %v41_v6  ;;  %v45_v14 = vld [vmem:[%s4269_s0 + $0x78] sm:$0xff]  ;;  %v36_v15 = vld [vmem:[%s4269_s0 + $0x30] sm:$0xff]  ;;  %v38_v17 = vld [vmem:[%s4269_s0 + $0x40] sm:$0xff]  ;;  %vm3336_vm9 = vmmov 0   ;;  %s3337_s15 = smov [#allocation2]   ;;  %vm2809_vm10 = vcmask 74752  }
   0x9   :  { %3058 = vmatprep.mubr.msk.f32.mxu0 %vm48_vm3, %v32_v7  ;;  %3073 = vmatprep.mubr.msk.f32.mxu1 %vm48_vm3, %v42_v8  ;;  %v37_v16 = vld [vmem:[%s4269_s0 + $0x38] sm:$0xff]  ;;  %v39_v18 = vld [vmem:[%s4269_s0 + $0x48] sm:$0xff]  ;;  %v491_v31 = vld [vmem:[%s4271_s2 + $0x4] sm:$0xf]  ;;  %s2817_s16 = sshll.u32 %s3337_s15, 4  ;;  %s2818_s16 = int_to_ptr.vmem [resolvable:$true] %s2817_s16 }
   0xa   :  { %3079 = vmatprep.subr.msk.mxu1 %vm470_vm5, %v491_v31  ;;  %v3474_v45 = vld [vmem:[%s4271_s2] sm:$0xf]  ;;  %s3310_s0 = scalar_lea.vmem %s2818_s16, 32  ;;  %p3315_p1 = scmp.lt.s32.totalorder %s2818_s16, %s2818_s16 }
   0xb   :  { %3080 = vmatpush3.msk.msra.mxu1 %vm470_vm5, %v491_v31  ;;  %p3311_p0 = scmp.ne.s32.totalorder %s2818_s16, %s3310_s0  ;;  %p3316_p2 = scmp.lt.s32.totalorder %s3310_s0, %s3310_s0 }
   0xc   :  { %3059 = vmatmul.mubr.msk.f32.gmra.mrb[2].mxu0 %vm48_vm3, %v33_v9  ;;  %3074 = vmatmul.mubr.msk.f32.gmra.mrb[2].mxu1 %vm48_vm3, %v43_v10 }
   0xd   :  { %3061 = vmatprep.mubr.msk.f32.mxu0 %vm48_vm3, %v34_v11  ;;  %3076 = vmatprep.mubr.msk.f32.mxu1 %vm48_vm3, %v44_v12  ;;  %p3317_p3 = por %p3316_p2, %p3315_p1 }
   0xe   :  { %3087 = vmatprep.subr.msk.mxu1 %vm470_vm5, %v3474_v45 }
   0xf   :  { %p3318_p4 = pnand %p3317_p3, %p3311_p0 }
  0x10   :  { %3062 = vmatmul.mubr.msk.f32.gmra.mrb[4].mxu0 %vm48_vm3, %v35_v13  ;;  %3077 = vmatmul.mubr.msk.f32.gmra.mrb[4].mxu1 %vm48_vm3, %v45_v14 }
  0x11   :  { %3064 = vmatprep.mubr.msk.f32.mxu0 %vm48_vm3, %v36_v15 }
  0x14   :  { %3065 = vmatmul.mubr.msk.f32.gmra.mrb[6].mxu0 %vm48_vm3, %v37_v16 }
  0x15   :  { %3067 = vmatprep.mubr.msk.f32.mxu0 %vm48_vm3, %v38_v17 }
  0x18   :  { %3068 = vmatmul.mubr.msk.f32.gmra.mrb[8].mxu0 %vm48_vm3, %v39_v18 }
  0xdb   :  { %v3057_v19 = vpop.f32.mrb[0].mxu0  ;;  %v3454_v20 = vpop.f32.mrb[0].mxu1 }
  0xdc   :  { %v250_v21 = vsel %vm248_vm4, %v3057_v19, 0.0  ;;  %v167_v22 = vpop.f32.mrb[1].mxu0  ;;  %v3457_v23 = vpop.f32.mrb[1].mxu1  ;;  %v270_v58 = vsel %vm248_vm4, %v3454_v20, 0.0 }
  0xdd   :  { %v249_v24 = vsel %vm248_vm4, %v167_v22, 0.0  ;;  %v268_v55 = vsel %vm248_vm4, %v3457_v23, 0.0 }
  0xde   :  { %v251_v25 = vadd.f32 %v250_v21, %v249_v24 }
  0xdf   :  { %v3060_v26 = vpop.f32.mrb[2].mxu0  ;;  %v3460_v27 = vpop.f32.mrb[2].mxu1 }
  0xe0   :  { %v177_v28 = vpop.f32.mrb[3].mxu0  ;;  %v227_v29 = vpop.f32.mrb[3].mxu1  ;;  %v254_v33 = vsel %vm248_vm4, %v3060_v26, 0.0  ;;  %v274_v62 = vsel %vm248_vm4, %v3460_v27, 0.0 }
  0xe1   :  { %v252_v30 = vsel %vm248_vm4, %v177_v28, 0.0  ;;  %v272_v59 = vsel %vm248_vm4, %v227_v29, 0.0 }
  0xe2   :  { %v253_v32 = vadd.f32 %v252_v30, %v251_v25 }
  0xe3   :  { %v3063_v34 = vpop.f32.mrb[4].mxu0  ;;  %v3078_v35 = vpop.f32.mrb[4].mxu1 }
  0xe4   :  { %v187_v36 = vpop.f32.mrb[5].mxu0  ;;  %v255_v37 = vadd.f32 %v254_v33, %v253_v32  ;;  %v237_v38 = vpop.f32.mrb[5].mxu1  ;;  %v258_v41 = vsel %vm248_vm4, %v3063_v34, 0.0  ;;  %v278_v2 = vsel %vm248_vm4, %v3078_v35, 0.0 }
  0xe5   :  { %v256_v39 = vsel %vm248_vm4, %v187_v36, 0.0  ;;  %v276_v63 = vsel %vm248_vm4, %v237_v38, 0.0 }
  0xe6   :  { %v257_v40 = vadd.f32 %v256_v39, %v255_v37 }
  0xe7   :  { %v3066_v42 = vpop.f32.mrb[6].mxu0 }
  0xe8   :  { %v197_v43 = vpop.f32.mrb[7].mxu0  ;;  %v259_v44 = vadd.f32 %v258_v41, %v257_v40  ;;  %v262_v48 = vsel %vm248_vm4, %v3066_v42, 0.0 }
  0xe9   :  { %v260_v46 = vsel %vm248_vm4, %v197_v43, 0.0 }
  0xea   :  { %v261_v47 = vadd.f32 %v260_v46, %v259_v44 }
  0xeb   :  { %v3069_v49 = vpop.f32.mrb[8].mxu0 }
  0xec   :  { %v207_v50 = vpop.f32.mrb[9].mxu0  ;;  %v263_v51 = vadd.f32 %v262_v48, %v261_v47  ;;  %v266_v54 = vsel %vm248_vm4, %v3069_v49, 0.0 }
  0xed   :  { %v264_v52 = vsel %vm248_vm4, %v207_v50, 0.0 }
  0xee   :  { %v265_v53 = vadd.f32 %v264_v52, %v263_v51 }
  0xf0   :  { %v267_v56 = vadd.f32 %v266_v54, %v265_v53 }
  0xf2   :  { %v269_v57 = vadd.f32 %v268_v55, %v267_v56 }
  0xf4   :  { %v271_v60 = vadd.f32 %v270_v58, %v269_v57 }
  0xf6   :  { %v273_v61 = vadd.f32 %v272_v59, %v271_v60 }
  0xf8   :  { %v275_v0 = vadd.f32 %v274_v62, %v273_v61 }
  0xfa   :  { %v277_v1 = vadd.f32 %v276_v63, %v275_v0 }
  0xfc   :  { %v279_v3 = vadd.f32 %v278_v2, %v277_v1 }
  0xfe   :  { %v280_v4 = vrot.slane %v279_v3, 4 }
 0x100   :  { %v281_v5 = vadd.f32 %v280_v4, %v279_v3 }
 0x102   :  { %v282_v6 = vrot.slane %v281_v5, 2 }
 0x104   :  { %v283_v7 = vadd.f32 %v282_v6, %v281_v5 }
 0x106   :  { %v284_v8 = vrot.slane %v283_v7, 1 }
 0x108   :  { %v285_v9 = vadd.f32 %v284_v8, %v283_v7 }
 0x10a   :  { %v287_v10 = vmul.f32 0.0078125, %v285_v9 }
 0x10c   :  { %v3491_v11 = vsub.f32 %v167_v22, %v287_v10  ;;  %v3493_v12 = vsub.f32 %v3057_v19, %v287_v10  ;;  %v3495_v13 = vsub.f32 %v177_v28, %v287_v10  ;;  %v3497_v14 = vsub.f32 %v3060_v26, %v287_v10 }
 0x10d   :  { %v3499_v15 = vsub.f32 %v187_v36, %v287_v10  ;;  %v3501_v16 = vsub.f32 %v3063_v34, %v287_v10  ;;  %v3503_v17 = vsub.f32 %v197_v43, %v287_v10  ;;  %v3505_v18 = vsub.f32 %v3066_v42, %v287_v10 }
 0x10e   :  { %v3507_v21 = vsub.f32 %v207_v50, %v287_v10  ;;  %v3509_v24 = vsub.f32 %v3069_v49, %v287_v10  ;;  %v3512_v22 = vsub.f32 %v3457_v23, %v287_v10  ;;  %v3515_v19 = vsub.f32 %v3454_v20, %v287_v10 }
 0x10f   :  { %v3517_v25 = vsub.f32 %v227_v29, %v287_v10  ;;  %v3520_v26 = vsub.f32 %v3460_v27, %v287_v10  ;;  %v3522_v28 = vsub.f32 %v237_v38, %v287_v10  ;;  %v3524_v30 = vsub.f32 %v3078_v35, %v287_v10 }
 0x110   :  { %v304_v31 = vmul.f32 %v3491_v11, %v3491_v11  ;;  %v305_v32 = vmul.f32 %v3493_v12, %v3493_v12  ;;  %v306_v23 = vmul.f32 %v3495_v13, %v3495_v13  ;;  %v307_v20 = vmul.f32 %v3497_v14, %v3497_v14 }
 0x111   :  { %v308_v34 = vmul.f32 %v3499_v15, %v3499_v15  ;;  %v309_v37 = vmul.f32 %v3501_v16, %v3501_v16  ;;  %v310_v40 = vmul.f32 %v3503_v17, %v3503_v17  ;;  %v311_v43 = vmul.f32 %v3505_v18, %v3505_v18 }
 0x112   :  { %v320_v29 = vsel %vm248_vm4, %v304_v31, 0.0  ;;  %v321_v27 = vsel %vm248_vm4, %v305_v32, 0.0  ;;  %v323_v35 = vsel %vm248_vm4, %v306_v23, 0.0  ;;  %v325_v38 = vsel %vm248_vm4, %v307_v20, 0.0 }
 0x113   :  { %v322_v33 = vadd.f32 %v321_v27, %v320_v29  ;;  %v327_v41 = vsel %vm248_vm4, %v308_v34, 0.0  ;;  %v329_v44 = vsel %vm248_vm4, %v309_v37, 0.0  ;;  %v312_v47 = vmul.f32 %v3507_v21, %v3507_v21 }
 0x114   :  { %v331_v48 = vsel %vm248_vm4, %v310_v40, 0.0  ;;  %v313_v50 = vmul.f32 %v3509_v24, %v3509_v24  ;;  %v333_v51 = vsel %vm248_vm4, %v311_v43, 0.0  ;;  %v314_v53 = vmul.f32 %v3512_v22, %v3512_v22  ;;  %v2842_v40 = vld [vmem:[%s4273_s4] ss:$0 sm:$0xff] }
 0x115   :  { %v324_v36 = vadd.f32 %v323_v35, %v322_v33  ;;  %v335_v54 = vsel %vm248_vm4, %v312_v47, 0.0  ;;  %v315_v56 = vmul.f32 %v3515_v19, %v3515_v19  ;;  %v316_v59 = vmul.f32 %v3517_v25, %v3517_v25 }
 0x116   :  { %v337_v57 = vsel %vm248_vm4, %v313_v50, 0.0  ;;  %v339_v60 = vsel %vm248_vm4, %v314_v53, 0.0  ;;  %v317_v62 = vmul.f32 %v3520_v26, %v3520_v26  ;;  %v318_v1 = vmul.f32 %v3522_v28, %v3522_v28 }
 0x117   :  { %v326_v39 = vadd.f32 %v325_v38, %v324_v36  ;;  %v341_v63 = vsel %vm248_vm4, %v315_v56, 0.0  ;;  %v343_v2 = vsel %vm248_vm4, %v316_v59, 0.0  ;;  %v319_v4 = vmul.f32 %v3524_v30, %v3524_v30 }
 0x118   :  { %v345_v5 = vsel %vm248_vm4, %v317_v62, 0.0  ;;  %v347_v7 = vsel %vm248_vm4, %v318_v1, 0.0 }
 0x119   :  { %v328_v42 = vadd.f32 %v327_v41, %v326_v39  ;;  %v349_v9 = vsel %vm248_vm4, %v319_v4, 0.0 }
 0x11b   :  { %v330_v46 = vadd.f32 %v329_v44, %v328_v42 }
 0x11d   :  { %v332_v49 = vadd.f32 %v331_v48, %v330_v46 }
 0x11f   :  { %v334_v52 = vadd.f32 %v333_v51, %v332_v49 }
 0x121   :  { %v336_v55 = vadd.f32 %v335_v54, %v334_v52 }
 0x123   :  { %v338_v58 = vadd.f32 %v337_v57, %v336_v55 }
 0x125   :  { %v340_v61 = vadd.f32 %v339_v60, %v338_v58 }
 0x127   :  { %v342_v0 = vadd.f32 %v341_v63, %v340_v61 }
 0x129   :  { %v344_v3 = vadd.f32 %v343_v2, %v342_v0 }
 0x12b   :  { %v346_v6 = vadd.f32 %v345_v5, %v344_v3 }
 0x12d   :  { %v348_v8 = vadd.f32 %v347_v7, %v346_v6 }
 0x12f   :  { %v350_v10 = vadd.f32 %v349_v9, %v348_v8 }
 0x131   :  { %v351_v31 = vrot.slane %v350_v10, 4 }
 0x133   :  { %v352_v32 = vadd.f32 %v351_v31, %v350_v10 }
 0x135   :  { %v353_v23 = vrot.slane %v352_v32, 2 }
 0x137   :  { %v354_v20 = vadd.f32 %v353_v23, %v352_v32 }
 0x139   :  { %v355_v29 = vrot.slane %v354_v20, 1 }
 0x13b   :  { %v356_v27 = vadd.f32 %v355_v29, %v354_v20 }
 0x13d   :  { %v357_v33 = vmul.f32 0.0078125, %v356_v27 }
 0x13f   :  { %v358_v34 = vadd.f32 1e-05, %v357_v33 }
 0x141   :  { %3304 = vrsqrt.f32 %v358_v34 }
 0x14b   :  { %v3305_v35 = vpop.eup %3304 }
 0x14c   :  { %v360_v36 = vmul.f32 %v3305_v35, %v3491_v11  ;;  %v361_v37 = vmul.f32 %v3305_v35, %v3493_v12  ;;  %v362_v38 = vmul.f32 %v3305_v35, %v3495_v13  ;;  %v363_v39 = vmul.f32 %v3305_v35, %v3497_v14 }
 0x14d   :  { %v364_v41 = vmul.f32 %v3305_v35, %v3499_v15  ;;  %v365_v42 = vmul.f32 %v3305_v35, %v3501_v16  ;;  %v366_v43 = vmul.f32 %v3305_v35, %v3503_v17  ;;  %v367_v44 = vmul.f32 %v3305_v35, %v3505_v18 }
 0x14e   :  { %v368_v11 = vmul.f32 %v3305_v35, %v3507_v21  ;;  %v369_v12 = vmul.f32 %v3305_v35, %v3509_v24  ;;  %v370_v13 = vmul.f32 %v3305_v35, %v3512_v22  ;;  %v371_v14 = vmul.f32 %v3305_v35, %v3515_v19  ;;  %v2843_v21 = vld [vmem:[%s4273_s4 + $0x1] ss:$0 sm:$0xff] }
 0x14f   :  { %v372_v46 = vmul.f32 %v3305_v35, %v3517_v25  ;;  %v373_v47 = vmul.f32 %v3305_v35, %v3520_v26  ;;  %v374_v15 = vmul.f32 %v3305_v35, %v3522_v28  ;;  %v375_v16 = vmul.f32 %v3305_v35, %v3524_v30 }
 0x150   :  { %v380_v48 = vmul.f32 %v2842_v40, %v360_v36  ;;  %v381_v17 = vmul.f32 %v2842_v40, %v361_v37  ;;  %v382_v49 = vmul.f32 %v2842_v40, %v362_v38  ;;  %v383_v18 = vmul.f32 %v2842_v40, %v363_v39 }
 0x151   :  { %v384_v24 = vmul.f32 %v2842_v40, %v364_v41  ;;  %v385_v22 = vmul.f32 %v2842_v40, %v365_v42  ;;  %v386_v50 = vmul.f32 %v2842_v40, %v366_v43  ;;  %v387_v19 = vmul.f32 %v2842_v40, %v367_v44 }
 0x152   :  { %v388_v51 = vmul.f32 %v2842_v40, %v368_v11  ;;  %v389_v25 = vmul.f32 %v2842_v40, %v369_v12  ;;  %v390_v52 = vmul.f32 %v2842_v40, %v370_v13  ;;  %v391_v26 = vmul.f32 %v2842_v40, %v371_v14 }
 0x153   :  { %v392_v53 = vmul.f32 %v2842_v40, %v372_v46  ;;  %v393_v28 = vmul.f32 %v2842_v40, %v373_v47  ;;  %v394_v54 = vmul.f32 %v2842_v40, %v374_v15  ;;  %v395_v30 = vmul.f32 %v2842_v40, %v375_v16 }
 0x154   :  { %v400_v55 = vadd.f32 %v2843_v21, %v380_v48  ;;  %v401_v56 = vadd.f32 %v2843_v21, %v381_v17  ;;  %v402_v57 = vadd.f32 %v2843_v21, %v382_v49  ;;  %v403_v58 = vadd.f32 %v2843_v21, %v383_v18  ;;  %v3609_v48 = vld [vmem:[%s4276_s7 + $0x20] sm:$0xff]  ;;  %v3614_v17 = vld [vmem:[%s4276_s7 + $0x28] sm:$0xff] }
 0x155   :  { %v404_v59 = vadd.f32 %v2843_v21, %v384_v24  ;;  %v405_v60 = vadd.f32 %v2843_v21, %v385_v22  ;;  %v406_v61 = vadd.f32 %v2843_v21, %v386_v50  ;;  %v407_v62 = vadd.f32 %v2843_v21, %v387_v19  ;;  %v3628_v50 = vld [vmem:[%s4276_s7 + $0x30] sm:$0xff] }
 0x156   :  { %v408_v63 = vadd.f32 %v2843_v21, %v388_v51  ;;  %v409_v0 = vadd.f32 %v2843_v21, %v389_v25  ;;  %v410_v1 = vadd.f32 %v2843_v21, %v390_v52  ;;  %v411_v2 = vadd.f32 %v2843_v21, %v391_v26 }
 0x157   :  { %v412_v3 = vadd.f32 %v2843_v21, %v392_v53  ;;  %v413_v4 = vadd.f32 %v2843_v21, %v393_v28  ;;  %v414_v5 = vadd.f32 %v2843_v21, %v394_v54  ;;  %v415_v6 = vadd.f32 %v2843_v21, %v395_v30  ;;  %v3645_v53 = vld [vmem:[%s4276_s7 + $0x38] sm:$0xff]  ;;  %v713_v54 = vld [vmem:[%s4271_s2 + $0x8] sm:$0xf] }
 0x158   :  { %v416_v7 = vmax.f32 %v400_v55, 0.0  ;;  %v417_v8 = vmax.f32 %v401_v56, 0.0  ;;  %v418_v9 = vmax.f32 %v402_v57, 0.0  ;;  %v419_v10 = vmax.f32 %v403_v58, 0.0  ;;  %v3656_v55 = vld [vmem:[%s4276_s7] sm:$0xff] }
 0x159   :  { %v420_v31 = vmax.f32 %v404_v59, 0.0  ;;  %v421_v32 = vmax.f32 %v405_v60, 0.0  ;;  %v422_v23 = vmax.f32 %v406_v61, 0.0  ;;  %v423_v20 = vmax.f32 %v407_v62, 0.0  ;;  %v3671_v59 = vld [vmem:[%s4276_s7 + $0x8] sm:$0xff]  ;;  %v3682_v62 = vld [vmem:[%s4276_s7 + $0x10] sm:$0xff] }
 0x15a   :  { %v424_v29 = vmax.f32 %v408_v63, 0.0  ;;  %v425_v27 = vmax.f32 %v409_v0, 0.0  ;;  %v426_v33 = vmax.f32 %v410_v1, 0.0  ;;  %v427_v34 = vmax.f32 %v411_v2, 0.0 }
 0x15b   :  { %v428_v35 = vmax.f32 %v412_v3, 0.0  ;;  %v429_v36 = vmax.f32 %v413_v4, 0.0  ;;  %v430_v37 = vmax.f32 %v414_v5, 0.0  ;;  %v431_v38 = vmax.f32 %v415_v6, 0.0  ;;  %v3698_v3 = vld [vmem:[%s4276_s7 + $0x18] sm:$0xff] }
 0x15c   :  { %v432_v39 = vmax.f32 %v416_v7, %v420_v31  ;;  %v433_v40 = vmax.f32 %v417_v8, %v421_v32  ;;  %v434_v41 = vmax.f32 %v418_v9, %v422_v23  ;;  %v435_v42 = vmax.f32 %v419_v10, %v423_v20  ;;  %v838_v5 = vld [vmem:[%s4271_s2 + $0xc] sm:$0xf]  ;;  %v3709_v7 = vld [vmem:[%s4276_s7 + $0x40] sm:$0xff] }
 0x15d   :  { %v436_v43 = vmax.f32 %v424_v29, %v428_v35  ;;  %v437_v44 = vmax.f32 %v425_v27, %v429_v36  ;;  %v438_v11 = vmax.f32 %v426_v33, %v430_v37  ;;  %v439_v12 = vmax.f32 %v427_v34, %v431_v38  ;;  %v3723_v31 = vld [vmem:[%s4276_s7 + $0x48] sm:$0xff]  ;;  %v3734_v29 = vld [vmem:[%s4276_s7 + $0x50] sm:$0xff]  ;;  %v3750_v36 = vld [vmem:[%s4276_s7 + $0x58] sm:$0xff] }
 0x15e   :  { %v951_v38 = vld [vmem:[%s4271_s2 + $0x10] sm:$0xf] }
 0x15f   :  { %v3596_v13 = vmax.f32 %v432_v39, %v436_v43  ;;  %v3598_v14 = vmax.f32 %v433_v40, %v437_v44  ;;  %v3600_v46 = vmax.f32 %v434_v41, %v438_v11  ;;  %v3602_v47 = vmax.f32 %v435_v42, %v439_v12  ;;  %v3761_v40 = vld [vmem:[%s4276_s7 + $0x60] sm:$0xff]  ;;  %v3773_v44 = vld [vmem:[%s4276_s7 + $0x68] sm:$0xff] }
 0x161   :  { %4282 = vst [vmem:[#allocation5_spill] sm:$0xff] %v3602_v47  ;;  %v471_v15 = vrot.slane %v3596_v13, 4  ;;  %v472_v16 = vrot.slane %v3598_v14, 4  ;;  %v474_v49 = vrot.slane %v3600_v46, 4  ;;  %v476_v18 = vrot.slane %v3602_v47, 4 }
 0x162   :  { %v449_v19 = vrot.slane %v3596_v13, 3  ;;  %v450_v28 = vrot.slane %v3598_v14, 3  ;;  %v452_v56 = vrot.slane %v3600_v46, 3  ;;  %v454_v61 = vrot.slane %v3602_v47, 3 }
 0x163   :  { %v3619_v21 = vsel %vm470_vm5, %v471_v15, %v472_v16  ;;  %v482_v24 = vsel %vm470_vm5, 0.0, %v471_v15  ;;  %v3623_v22 = vsel %vm470_vm5, %v472_v16, %v474_v49  ;;  %v3640_v26 = vsel %vm470_vm5, %v474_v49, %v476_v18  ;;  %v3782_v16 = vld [vmem:[%s4276_s7 + $0x70] sm:$0xff] }
 0x164   :  { %v487_v51 = vmul.f32 %v3609_v48, %v482_v24  ;;  %v488_v25 = vmul.f32 %v3614_v17, %v3619_v21  ;;  %v489_v52 = vmul.f32 %v3628_v50, %v3623_v22  ;;  %v460_v30 = vsel %vm448_vm6, 0.0, %v449_v19 }
 0x165   :  { %v490_v57 = vmul.f32 %v3645_v53, %v3640_v26  ;;  %v3666_v58 = vsel %vm448_vm6, %v449_v19, %v450_v28  ;;  %v465_v60 = vmul.f32 %v3656_v55, %v460_v30  ;;  %v693_v63 = vrot.slane %v3596_v13, 5  ;;  %v3811_v30 = vld [vmem:[%s4276_s7 + $0x88] sm:$0xff] }
 0x166   :  { %3081 = vmatprep.mubr.msk.f32.mxu1 %vm248_vm4, %v487_v51  ;;  %v466_v0 = vmul.f32 %v3671_v59, %v3666_v58  ;;  %v3693_v2 = vsel %vm448_vm6, %v452_v56, %v454_v61  ;;  %v694_v4 = vrot.slane %v3598_v14, 5  ;;  %v696_v8 = vrot.slane %v3600_v46, 5  ;;  %v3791_v51 = vld [vmem:[%s4276_s7 + $0x78] sm:$0xff] }
 0x167   :  { %3082 = vmatmul.mubr.msk.f32.vlgmr.msra.gmra.mrb[6].mxu1 %vm248_vm4, %v488_v25  ;;  %v704_v6 = vsel %vm692_vm7, 0.0, %v693_v63  ;;  %v468_v9 = vmul.f32 %v3698_v3, %v3693_v2  ;;  %v698_v23 = vrot.slane %v3602_v47, 5  ;;  %v818_v27 = vrot.slane %v3596_v13, 7  ;;  %v1077_v25 = vld [vmem:[%s4271_s2 + $0x14] sm:$0xf] }
 0x168   :  { %3088 = vmatpush3.msk.msra.mxu1 %vm470_vm5, %v3474_v45  ;;  %3084 = vmatprep.mubr.msk.f32.mxu1 %vm248_vm4, %v489_v52  ;;  %v3677_v45 = vsel %vm448_vm6, %v450_v28, %v452_v56  ;;  %v3718_v10 = vsel %vm692_vm7, %v693_v63, %v694_v4  ;;  %v709_v32 = vmul.f32 %v3709_v7, %v704_v6  ;;  %v819_v37 = vrot.slane %v3598_v14, 7  ;;  %v3800_v52 = vld [vmem:[%s4276_s7 + $0x80] sm:$0xff]  ;;  %v3817_v56 = vld [vmem:[%s4276_s7 + $0x90] sm:$0xff] }
 0x169   :  { %3095 = vmatprep.subr.msk.mxu1 %vm470_vm5, %v713_v54  ;;  %v467_v1 = vmul.f32 %v3682_v62, %v3677_v45  ;;  %v3729_v20 = vsel %vm692_vm7, %v694_v4, %v696_v8  ;;  %v710_v33 = vmul.f32 %v3723_v31, %v3718_v10  ;;  %v3745_v35 = vsel %vm692_vm7, %v696_v8, %v698_v23  ;;  %v3840_v8 = vld [vmem:[%s4276_s7 + $0xa0] sm:$0xff] }
 0x16a   :  { %v711_v34 = vmul.f32 %v3734_v29, %v3729_v20  ;;  %v829_v39 = vsel %vm97_vm0, 0.0, %v818_v27  ;;  %v821_v41 = vrot.slane %v3600_v46, 7  ;;  %v712_v42 = vmul.f32 %v3750_v36, %v3745_v35 }
 0x16b   :  { %3085 = vmatmul.mubr.msk.f32.gmra.mrb[8].mxu1 %vm248_vm4, %v490_v57  ;;  %v820_v43 = vsel %vm97_vm0, %v818_v27, %v819_v37  ;;  %v834_v11 = vmul.f32 %v3761_v40, %v829_v39  ;;  %v823_v12 = vrot.slane %v3602_v47, 7  ;;  %v1057_v57 = vrot.slane %v3596_v13, 1 }
 0x16c   :  { %3089 = vmatprep.mubr.msk.f32.mxu1 %vm248_vm4, %v465_v60  ;;  %v822_v15 = vsel %vm97_vm0, %v819_v37, %v821_v41  ;;  %v835_v49 = vmul.f32 %v3773_v44, %v820_v43  ;;  %v1058_v60 = vrot.slane %v3598_v14, 1  ;;  %v948_v63 = vmul.f32 %v3811_v30, %v3598_v14  ;;  %v3869_v43 = vld [vmem:[%s4276_s7 + $0xb8] sm:$0xff] }
 0x16d   :  { %v836_v24 = vmul.f32 %v3782_v16, %v822_v15  ;;  %v824_v19 = vsel %vm97_vm0, %v821_v41, %v823_v12  ;;  %v1060_v4 = vrot.slane %v3600_v46, 1  ;;  %v3878_v12 = vld [vmem:[%s4276_s7 + $0xc0] sm:$0xff] }
 0x16e   :  { %v837_v28 = vmul.f32 %v3791_v51, %v824_v19  ;;  %v1059_v6 = vsel %vm1056_vm8, %v1057_v57, %v1058_v60  ;;  %v3895_v19 = vld [vmem:[%s4276_s7 + $0xd0] sm:$0xff]  ;;  %v1422_v57 = vld [vmem:[%s4271_s2 + $0x20] sm:$0xf] }
 0x16f   :  { %3090 = vmatmul.mubr.msk.f32.vlgmr.msra.gmra.mrb[6].mxu1 %vm248_vm4, %v466_v0  ;;  %v949_v0 = vmul.f32 %v3817_v56, %v3600_v46  ;;  %v1061_v27 = vsel %vm1056_vm8, %v1058_v60, %v1060_v4 }
 0x170   :  { %3096 = vmatpush3.msk.msra.mxu1 %vm470_vm5, %v713_v54  ;;  %3092 = vmatprep.mubr.msk.f32.mxu1 %vm248_vm4, %v467_v1  ;;  %v947_v54 = vmul.f32 %v3800_v52, %v3596_v13  ;;  %v3829_v1 = vld [vmem:[%s4276_s7 + $0x98] sm:$0xff] }
 0x171   :  { %3103 = vmatprep.subr.msk.mxu1 %vm470_vm5, %v838_v5 }
 0x173   :  { %3093 = vmatmul.mubr.msk.f32.gmra.mrb[8].mxu1 %vm248_vm4, %v468_v9  ;;  %v1062_v9 = vrot.slane %v3602_v47, 1 }
 0x174   :  { %3097 = vmatprep.mubr.msk.f32.mxu1 %vm248_vm4, %v709_v32  ;;  %v950_v32 = vmul.f32 %v3829_v1, %v3602_v47 }
 0x175   :  { %v1063_v37 = vsel %vm1056_vm8, %v1060_v4, %v1062_v9 }
 0x177   :  { %3098 = vmatmul.mubr.msk.f32.vlgmr.msra.gmra.mrb[6].mxu1 %vm248_vm4, %v710_v33  ;;  %v1073_v33 = vmul.f32 %v3840_v8, %v1059_v6  ;;  %v3953_v6 = vld [vmem:[%s4276_s7 + $0x100] sm:$0xff] }
 0x178   :  { %3104 = vmatpush3.msk.msra.mxu1 %vm470_vm5, %v838_v5  ;;  %3100 = vmatprep.mubr.msk.f32.mxu1 %vm248_vm4, %v711_v34  ;;  %v1192_v5 = vld [vmem:[%s4271_s2 + $0x18] sm:$0xf]  ;;  %v3853_v34 = vld [vmem:[%s4276_s7 + $0xa8] sm:$0xff] }
 0x179   :  { %3111 = vmatprep.subr.msk.mxu1 %vm470_vm5, %v951_v38  ;;  %v1074_v39 = vmul.f32 %v3853_v34, %v1061_v27 }
 0x17b   :  { %3101 = vmatmul.mubr.msk.f32.gmra.mrb[8].mxu1 %vm248_vm4, %v712_v42  ;;  %v1068_v42 = vsel %vm1056_vm8, %v1062_v9, 0.0  ;;  %v3969_v9 = vld [vmem:[%s4276_s7 + $0x110] sm:$0xff] }
 0x17c   :  { %3105 = vmatprep.mubr.msk.f32.mxu1 %vm248_vm4, %v834_v11  ;;  %v1307_v11 = vld [vmem:[%s4271_s2 + $0x1c] sm:$0xf]  ;;  %v1076_v15 = vmul.f32 %v3869_v43, %v1068_v42  ;;  %v1420_v27 = vmul.f32 %v3969_v9, %v3745_v35 }
 0x17f   :  { %3106 = vmatmul.mubr.msk.f32.vlgmr.msra.gmra.mrb[6].mxu1 %vm248_vm4, %v835_v49  ;;  %v3887_v49 = vld [vmem:[%s4276_s7 + $0xc8] sm:$0xff] }
 0x180   :  { %3112 = vmatpush3.msk.msra.mxu1 %vm470_vm5, %v951_v38  ;;  %3108 = vmatprep.mubr.msk.f32.mxu1 %vm248_vm4, %v836_v24  ;;  %v3860_v38 = vld [vmem:[%s4276_s7 + $0xb0] sm:$0xff]  ;;  %v1188_v24 = vmul.f32 %v3878_v12, %v3666_v58  ;;  %v3908_v58 = vld [vmem:[%s4276_s7 + $0xd8] sm:$0xff] }
 0x181   :  { %3119 = vmatprep.subr.msk.mxu1 %vm470_vm5, %v1077_v25  ;;  %v1075_v41 = vmul.f32 %v3860_v38, %v1063_v37 }
 0x183   :  { %3109 = vmatmul.mubr.msk.f32.gmra.mrb[8].mxu1 %vm248_vm4, %v837_v28  ;;  %v1190_v28 = vmul.f32 %v3895_v19, %v3693_v2  ;;  %v3926_v2 = vld [vmem:[%s4276_s7 + $0xe8] sm:$0xff] }
 0x184   :  { %3113 = vmatprep.mubr.msk.f32.mxu1 %vm248_vm4, %v947_v54  ;;  %v1183_v54 = vsel %vm448_vm6, %v454_v61, 0.0 }
 0x185   :  { %v1191_v61 = vmul.f32 %v3908_v58, %v1183_v54 }
 0x187   :  { %3114 = vmatmul.mubr.msk.f32.vlgmr.msra.gmra.mrb[6].mxu1 %vm248_vm4, %v948_v63  ;;  %v3934_v63 = vld [vmem:[%s4276_s7 + $0xf0] sm:$0xff] }
 0x188   :  { %3120 = vmatpush3.msk.msra.mxu1 %vm470_vm5, %v1077_v25  ;;  %3116 = vmatprep.mubr.msk.f32.mxu1 %vm248_vm4, %v949_v0  ;;  %v1189_v25 = vmul.f32 %v3887_v49, %v3677_v45  ;;  %v3917_v45 = vld [vmem:[%s4276_s7 + $0xe0] sm:$0xff]  ;;  %v1304_v0 = vmul.f32 %v3926_v2, %v3623_v22  ;;  %v1305_v4 = vmul.f32 %v3934_v63, %v3640_v26 }
 0x189   :  { %3127 = vmatprep.subr.msk.mxu1 %vm470_vm5, %v1192_v5  ;;  %v1303_v60 = vmul.f32 %v3917_v45, %v3619_v21  ;;  %v3947_v21 = vld [vmem:[%s4276_s7 + $0xf8] sm:$0xff]  ;;  %v1418_v26 = vmul.f32 %v3953_v6, %v3718_v10 }
 0x18a   :  { %v3982_v10 = vld [vmem:[%s4276_s7 + $0x118] sm:$0xff] }
 0x18b   :  { %3117 = vmatmul.mubr.msk.f32.gmra.mrb[8].mxu1 %vm248_vm4, %v950_v32 }
 0x18c   :  { %3121 = vmatprep.mubr.msk.f32.mxu1 %vm248_vm4, %v1073_v33  ;;  %v1413_v33 = vsel %vm692_vm7, %v698_v23, 0.0  ;;  %v3996_v23 = vld [vmem:[%s4272_s3] sm:$0xf] }
 0x18d   :  { %v1421_v37 = vmul.f32 %v3982_v10, %v1413_v33 }
 0x18f   :  { %3122 = vmatmul.mubr.msk.f32.vlgmr.msra.gmra.mrb[6].mxu1 %vm248_vm4, %v1074_v39 }
 0x190   :  { %3128 = vmatpush3.msk.msra.mxu1 %vm470_vm5, %v1192_v5  ;;  %3124 = vmatprep.mubr.msk.f32.mxu1 %vm248_vm4, %v1075_v41  ;;  %v1298_v5 = vsel %vm470_vm5, %v476_v18, 0.0  ;;  %v3961_v18 = vld [vmem:[%s4276_s7 + $0x108] sm:$0xff] }
 0x191   :  { %3135 = vmatprep.subr.msk.mxu1 %vm470_vm5, %v1307_v11  ;;  %v1306_v22 = vmul.f32 %v3947_v21, %v1298_v5  ;;  %v1419_v32 = vmul.f32 %v3961_v18, %v3729_v20  ;;  %v1629_v20 = vld [vmem:[%s4272_s3 + $0x4] sm:$0xf] }
 0x192   :  { %3151 = vmatprep.subr.msk.mxu0 %vm470_vm5, %v1629_v20 }
 0x193   :  { %3125 = vmatmul.mubr.msk.f32.gmra.mrb[8].mxu1 %vm248_vm4, %v1076_v15  ;;  %3152 = vmatpush3.msk.msra.mxu0 %vm470_vm5, %v1629_v20 }
 0x194   :  { %3129 = vmatprep.mubr.msk.f32.mxu1 %vm248_vm4, %v1188_v24  ;;  %3159 = vmatprep.subr.msk.mxu0 %vm470_vm5, %v3996_v23 }
 0x197   :  { %3130 = vmatmul.mubr.msk.f32.vlgmr.msra.gmra.mrb[6].mxu1 %vm248_vm4, %v1189_v25 }
 0x198   :  { %3136 = vmatpush3.msk.msra.mxu1 %vm470_vm5, %v1307_v11  ;;  %3132 = vmatprep.mubr.msk.f32.mxu1 %vm248_vm4, %v1190_v28 }
 0x199   :  { %3143 = vmatprep.subr.msk.mxu1 %vm470_vm5, %v1422_v57 }
 0x19b   :  { %3133 = vmatmul.mubr.msk.f32.gmra.mrb[8].mxu1 %vm248_vm4, %v1191_v61 }
 0x19c   :  { %3137 = vmatprep.mubr.msk.f32.mxu1 %vm248_vm4, %v1303_v60 }
 0x19f   :  { %3138 = vmatmul.mubr.msk.f32.vlgmr.msra.gmra.mrb[6].mxu1 %vm248_vm4, %v1304_v0 }
 0x1a0   :  { %3144 = vmatpush3.msk.msra.mxu1 %vm470_vm5, %v1422_v57  ;;  %3140 = vmatprep.mubr.msk.f32.mxu1 %vm248_vm4, %v1305_v4 }
 0x1a3   :  { %3141 = vmatmul.mubr.msk.f32.gmra.mrb[8].mxu1 %vm248_vm4, %v1306_v22 }
 0x1a4   :  { %3145 = vmatprep.mubr.msk.f32.mxu1 %vm248_vm4, %v1418_v26 }
 0x1a7   :  { %3146 = vmatmul.mubr.msk.f32.vlgmr.msra.gmra.mrb[6].mxu1 %vm248_vm4, %v1419_v32 }
 0x1a8   :  { %3148 = vmatprep.mubr.msk.f32.mxu1 %vm248_vm4, %v1420_v27 }
 0x1ab   :  { %3149 = vmatmul.mubr.msk.f32.gmra.mrb[8].mxu1 %vm248_vm4, %v1421_v37 }
 0x27a   :  { %v3147_v35 = vpop.f32.mrb[6].mxu1 }
 0x27b   :  { %v1530_v39 = vsel %vm248_vm4, %v3147_v35, 0.0  ;;  %v1504_v41 = vpop.f32.mrb[7].mxu1 }
 0x27c   :  { %v1529_v42 = vsel %vm248_vm4, %v1504_v41, 0.0 }
 0x27d   :  { %v1531_v11 = vadd.f32 %v1530_v39, %v1529_v42 }
 0x27e   :  { %v3150_v15 = vpop.f32.mrb[8].mxu1 }
 0x27f   :  { %v1514_v24 = vpop.f32.mrb[9].mxu1  ;;  %v1534_v54 = vsel %vm248_vm4, %v3150_v15, 0.0 }
 0x280   :  { %v1532_v25 = vsel %vm248_vm4, %v1514_v24, 0.0 }
 0x281   :  { %v1533_v28 = vadd.f32 %v1532_v25, %v1531_v11 }
 0x283   :  { %v1535_v57 = vadd.f32 %v1534_v54, %v1533_v28 }
 0x285   :  { %v1536_v61 = vrot.slane %v1535_v57, 4 }
 0x287   :  { %v1537_v60 = vadd.f32 %v1536_v61, %v1535_v57 }
 0x289   :  { %v1538_v0 = vrot.slane %v1537_v60, 2 }
 0x28b   :  { %v1539_v4 = vadd.f32 %v1538_v0, %v1537_v60 }
 0x28d   :  { %v1540_v5 = vrot.slane %v1539_v4, 1 }
 0x28f   :  { %v1541_v22 = vadd.f32 %v1540_v5, %v1539_v4 }
 0x291   :  { %v1543_v26 = vmul.f32 0.03125, %v1541_v22 }
 0x293   :  { %v1544_v32 = vsub.f32 %v1504_v41, %v1543_v26  ;;  %v1545_v27 = vsub.f32 %v3147_v35, %v1543_v26  ;;  %v1546_v33 = vsub.f32 %v1514_v24, %v1543_v26  ;;  %v1547_v37 = vsub.f32 %v3150_v15, %v1543_v26 }
 0x295   :  { %v1548_v20 = vmul.f32 %v1544_v32, %v1544_v32  ;;  %v1549_v39 = vmul.f32 %v1545_v27, %v1545_v27  ;;  %v1550_v42 = vmul.f32 %v1546_v33, %v1546_v33  ;;  %v1551_v47 = vmul.f32 %v1547_v37, %v1547_v37 }
 0x297   :  { %v1552_v11 = vsel %vm248_vm4, %v1548_v20, 0.0  ;;  %v1553_v25 = vsel %vm248_vm4, %v1549_v39, 0.0  ;;  %v1555_v54 = vsel %vm248_vm4, %v1550_v42, 0.0  ;;  %v1557_v61 = vsel %vm248_vm4, %v1551_v47, 0.0  ;;  %v2889_v20 = vld [vmem:[%s4273_s4 + $0x2] ss:$0 sm:$0xff] }
 0x298   :  { %v1554_v28 = vadd.f32 %v1553_v25, %v1552_v11  ;;  %v2890_v47 = vld [vmem:[%s4273_s4 + $0x3] ss:$0 sm:$0xff] }
 0x29a   :  { %v1556_v57 = vadd.f32 %v1555_v54, %v1554_v28 }
 0x29c   :  { %v1558_v60 = vadd.f32 %v1557_v61, %v1556_v57 }
 0x29e   :  { %v1559_v0 = vrot.slane %v1558_v60, 4 }
 0x2a0   :  { %v1560_v41 = vadd.f32 %v1559_v0, %v1558_v60 }
 0x2a2   :  { %v1561_v35 = vrot.slane %v1560_v41, 2 }
 0x2a4   :  { %v1562_v24 = vadd.f32 %v1561_v35, %v1560_v41 }
 0x2a6   :  { %v1563_v15 = vrot.slane %v1562_v24, 1 }
 0x2a8   :  { %v1564_v4 = vadd.f32 %v1563_v15, %v1562_v24 }
 0x2aa   :  { %v1565_v5 = vmul.f32 0.03125, %v1564_v4 }
 0x2ac   :  { %v1566_v22 = vadd.f32 1e-05, %v1565_v5 }
 0x2ae   :  { %3306 = vrsqrt.f32 %v1566_v22 }
 0x2b8   :  { %v3307_v26 = vpop.eup %3306 }
 0x2b9   :  { %v1568_v39 = vmul.f32 %v3307_v26, %v1544_v32  ;;  %v1569_v42 = vmul.f32 %v3307_v26, %v1545_v27  ;;  %v1570_v11 = vmul.f32 %v3307_v26, %v1546_v33  ;;  %v1571_v25 = vmul.f32 %v3307_v26, %v1547_v37 }
 0x2bb   :  { %v1576_v28 = vmul.f32 %v2889_v20, %v1568_v39  ;;  %v1577_v54 = vmul.f32 %v2889_v20, %v1569_v42  ;;  %v1578_v57 = vmul.f32 %v2889_v20, %v1570_v11  ;;  %v1579_v61 = vmul.f32 %v2889_v20, %v1571_v25 }
 0x2bd   :  { %v1584_v60 = vadd.f32 %v2890_v47, %v1576_v28  ;;  %v1585_v0 = vadd.f32 %v2890_v47, %v1577_v54  ;;  %v1586_v41 = vadd.f32 %v2890_v47, %v1578_v57  ;;  %v1587_v35 = vadd.f32 %v2890_v47, %v1579_v61 }
 0x2bf   :  { %v4014_v24 = vmax.f32 %v1584_v60, 0.0  ;;  %v4016_v15 = vmax.f32 %v1585_v0, 0.0  ;;  %v4018_v32 = vmax.f32 %v1586_v41, 0.0  ;;  %v4020_v27 = vmax.f32 %v1587_v35, 0.0 }
 0x2c1   :  { %v1613_v33 = vrot.slane %v4014_v24, 4  ;;  %v1614_v37 = vrot.slane %v4016_v15, 4  ;;  %v1616_v4 = vrot.slane %v4018_v32, 4  ;;  %v4280_v5 = vrot.slane %v4020_v27, 4 }
 0x2c2   :  { %v1596_v22 = vrot.slane %v4014_v24, 3  ;;  %v1597_v26 = vrot.slane %v4016_v15, 3  ;;  %v1599_v20 = vrot.slane %v4018_v32, 3  ;;  %v4281_v39 = vrot.slane %v4020_v27, 3 }
 0x2c3   :  { %v4031_v42 = vsel %vm470_vm5, %v1613_v33, %v1614_v37  ;;  %v1624_v11 = vsel %vm470_vm5, 0.0, %v1613_v33  ;;  %v4035_v25 = vsel %vm470_vm5, %v1614_v37, %v1616_v4  ;;  %v4040_v47 = vsel %vm470_vm5, %v1616_v4, %v4280_v5 }
 0x2c4   :  { %v1625_v28 = vmul.f32 %v1624_v11, %v3609_v48  ;;  %v1626_v54 = vmul.f32 %v4031_v42, %v3614_v17  ;;  %v4046_v57 = vsel %vm448_vm6, %v1596_v22, %v1597_v26  ;;  %v4049_v61 = vsel %vm448_vm6, %v1597_v26, %v1599_v20  ;;  %v1846_v48 = vld [vmem:[%s4272_s3 + $0x8] sm:$0xf] }
 0x2c5   :  { %v1627_v60 = vmul.f32 %v4035_v25, %v3628_v50  ;;  %v1607_v0 = vsel %vm448_vm6, 0.0, %v1596_v22  ;;  %v4062_v17 = vsel %vm448_vm6, %v1599_v20, %v4281_v39  ;;  %v1830_v41 = vrot.slane %v4014_v24, 5 }
 0x2c6   :  { %3153 = vmatprep.mubr.msk.f32.mxu0 %vm248_vm4, %v1625_v28  ;;  %v1831_v35 = vrot.slane %v4016_v15, 5  ;;  %v1833_v33 = vrot.slane %v4018_v32, 5  ;;  %v4279_v50 = vrot.slane %v4020_v27, 5  ;;  %v1951_v37 = vrot.slane %v4014_v24, 7 }
 0x2c7   :  { %3154 = vmatmul.mubr.msk.f32.vlgmr.msra.gmra.mrb[10].mxu0 %vm248_vm4, %v1626_v54  ;;  %v1952_v4 = vrot.slane %v4016_v15, 7  ;;  %v1628_v22 = vmul.f32 %v4040_v47, %v3645_v53  ;;  %v1608_v11 = vmul.f32 %v1607_v0, %v3656_v55  ;;  %v1610_v55 = vmul.f32 %v4049_v61, %v3682_v62  ;;  %v1967_v0 = vld [vmem:[%s4272_s3 + $0xc] sm:$0xf] }
 0x2c8   :  { %3160 = vmatpush3.msk.msra.mxu0 %vm470_vm5, %v3996_v23  ;;  %3156 = vmatprep.mubr.msk.f32.mxu0 %vm248_vm4, %v1627_v60  ;;  %v4077_v26 = vsel %vm692_vm7, %v1830_v41, %v1831_v35  ;;  %v4080_v20 = vsel %vm692_vm7, %v1831_v35, %v1833_v33  ;;  %v1954_v23 = vrot.slane %v4018_v32, 7  ;;  %v4088_v28 = vsel %vm692_vm7, %v1833_v33, %v4279_v50 }
 0x2c9   :  { %3167 = vmatprep.subr.msk.mxu0 %vm470_vm5, %v1846_v48  ;;  %v1953_v53 = vsel %vm97_vm0, %v1951_v37, %v1952_v4  ;;  %v1609_v60 = vmul.f32 %v4046_v57, %v3671_v59  ;;  %v1956_v35 = vrot.slane %v4020_v27, 7  ;;  %v2181_v33 = vrot.slane %v4014_v24, 1 }
 0x2ca   :  { %v1955_v54 = vsel %vm97_vm0, %v1952_v4, %v1954_v23  ;;  %v2184_v4 = vrot.slane %v4018_v32, 1  ;;  %v2186_v50 = vrot.slane %v4020_v27, 1  ;;  %v1611_v39 = vmul.f32 %v4062_v17, %v3698_v3  ;;  %v2076_v3 = vld [vmem:[%s4272_s3 + $0x10] sm:$0xf] }
 0x2cb   :  { %3157 = vmatmul.mubr.msk.f32.gmra.mrb[12].mxu0 %vm248_vm4, %v1628_v22  ;;  %v2182_v22 = vrot.slane %v4016_v15, 1  ;;  %v1957_v59 = vsel %vm97_vm0, %v1954_v23, %v1956_v35  ;;  %v1844_v23 = vmul.f32 %v4080_v20, %v3734_v29  ;;  %v1962_v35 = vsel %vm97_vm0, 0.0, %v1951_v37  ;;  %v2197_v37 = vld [vmem:[%s4272_s3 + $0x14] sm:$0xf] }
 0x2cc   :  { %3161 = vmatprep.mubr.msk.f32.mxu0 %vm248_vm4, %v1608_v11  ;;  %v1841_v11 = vsel %vm692_vm7, 0.0, %v1830_v41  ;;  %v1964_v29 = vmul.f32 %v1953_v53, %v3773_v44  ;;  %v2073_v44 = vmul.f32 %v4016_v15, %v3811_v30  ;;  %v2308_v53 = vld [vmem:[%s4272_s3 + $0x18] sm:$0xf]  ;;  %v2419_v15 = vld [vmem:[%s4272_s3 + $0x1c] sm:$0xf] }
 0x2cd   :  { %v2183_v62 = vsel %vm1056_vm8, %v2181_v33, %v2182_v22  ;;  %v2185_v5 = vsel %vm1056_vm8, %v2182_v22, %v2184_v4  ;;  %v1842_v41 = vmul.f32 %v1841_v11, %v3709_v7  ;;  %v1845_v7 = vmul.f32 %v4088_v28, %v3750_v36 }
 0x2ce   :  { %v1966_v36 = vmul.f32 %v1957_v59, %v3791_v51  ;;  %v2075_v51 = vmul.f32 %v4020_v27, %v3829_v1  ;;  %v2194_v30 = vmul.f32 %v2185_v5, %v3853_v34  ;;  %v2305_v34 = vmul.f32 %v4049_v61, %v3887_v49 }
 0x2cf   :  { %3162 = vmatmul.mubr.msk.f32.vlgmr.msra.gmra.mrb[10].mxu0 %vm248_vm4, %v1609_v60  ;;  %v2187_v60 = vsel %vm1056_vm8, %v2184_v4, %v2186_v50  ;;  %v2415_v49 = vmul.f32 %v4031_v42, %v3917_v45  ;;  %v4284_v61 = vrot.slane %v4020_v27, 4  ;;  %v2526_v45 = vmul.f32 %v4077_v26, %v3953_v6  ;;  %v2725_v6 = vld [vmem:[%s4274_s5] sm:$0xf] }
 0x2d0   :  { %3168 = vmatpush3.msk.msra.mxu0 %vm470_vm5, %v1846_v48  ;;  %3164 = vmatprep.mubr.msk.f32.mxu0 %vm248_vm4, %v1610_v55  ;;  %v1843_v48 = vmul.f32 %v4077_v26, %v3723_v31  ;;  %v1963_v31 = vmul.f32 %v1962_v35, %v3761_v40  ;;  %v2072_v40 = vmul.f32 %v4014_v24, %v3800_v52  ;;  %v2192_v24 = vsel %vm1056_vm8, %v2186_v50, 0.0 }
 0x2d1   :  { %3175 = vmatprep.subr.msk.mxu0 %vm470_vm5, %v1967_v0  ;;  %v2193_v52 = vmul.f32 %v2183_v62, %v3840_v8  ;;  %v2196_v1 = vmul.f32 %v2192_v24, %v3869_v43  ;;  %v2304_v8 = vmul.f32 %v4046_v57, %v3878_v12  ;;  %v2530_v43 = vld [vmem:[%s4272_s3 + $0x20] sm:$0xf]  ;;  %v2417_v57 = vmul.f32 %v4040_v47, %v3934_v63 }
 0x2d2   :  { %v2528_v63 = vmul.f32 %v4088_v28, %v3969_v9  ;;  %v4285_v42 = vrot.slane %v4020_v27, 5 }
 0x2d3   :  { %3165 = vmatmul.mubr.msk.f32.gmra.mrb[12].mxu0 %vm248_vm4, %v1611_v39  ;;  %v1965_v39 = vmul.f32 %v1955_v54, %v3782_v16  ;;  %v2074_v16 = vmul.f32 %v4018_v32, %v3817_v56  ;;  %v2195_v56 = vmul.f32 %v2187_v60, %v3860_v38  ;;  %v2306_v38 = vmul.f32 %v4062_v17, %v3895_v19 }
 0x2d4   :  { %3169 = vmatprep.mubr.msk.f32.mxu0 %vm248_vm4, %v1842_v41  ;;  %v4283_v32 = vrot.slane %v4020_v27, 3  ;;  %v2416_v19 = vmul.f32 %v4035_v25, %v3926_v2  ;;  %v2414_v17 = vsel %vm470_vm5, %v4284_v61, 0.0  ;;  %v2527_v2 = vmul.f32 %v4080_v20, %v3961_v18 }
 0x2d5   :  { %v2525_v25 = vsel %vm692_vm7, %v4285_v42, 0.0  ;;  %v3335_v18 = vmov 0.0  }
 0x2d6   :  { %v2303_v5 = vsel %vm448_vm6, %v4283_v32, 0.0  ;;  %3223 = vmatprep.subr.mxu1 %v3335_v18  ;;  %3225 = vmatprep.mubr.msk.f32.mxu1 %vm3336_vm9, %v3335_v18 }
 0x2d7   :  { %3170 = vmatmul.mubr.msk.f32.vlgmr.msra.gmra.mrb[10].mxu0 %vm248_vm4, %v1843_v48  ;;  %v2307_v12 = vmul.f32 %v2303_v5, %v3908_v58  ;;  %v2418_v58 = vmul.f32 %v2414_v17, %v3947_v21  ;;  %v2529_v21 = vmul.f32 %v2525_v25, %v3982_v10  ;;  %3224 = vmatpush3.msk.msra.mxu1 %vm470_vm5, %v2725_v6  ;;  %v4286_v6 = vld [vmem:[#allocation5_spill] sm:$0xff] }
 0x2d8   :  { %3176 = vmatpush3.msk.msra.mxu0 %vm470_vm5, %v1967_v0  ;;  %3172 = vmatprep.mubr.msk.f32.mxu0 %vm248_vm4, %v1844_v23 }
 0x2d9   :  { %3183 = vmatprep.subr.msk.mxu0 %vm470_vm5, %v2076_v3 }
 0x2db   :  { %3173 = vmatmul.mubr.msk.f32.gmra.mrb[12].mxu0 %vm248_vm4, %v1845_v7 }
 0x2dc   :  { %3177 = vmatprep.mubr.msk.f32.mxu0 %vm248_vm4, %v1963_v31 }
 0x2df   :  { %3178 = vmatmul.mubr.msk.f32.vlgmr.msra.gmra.mrb[10].mxu0 %vm248_vm4, %v1964_v29 }
 0x2e0   :  { %3184 = vmatpush3.msk.msra.mxu0 %vm470_vm5, %v2076_v3  ;;  %3180 = vmatprep.mubr.msk.f32.mxu0 %vm248_vm4, %v1965_v39 }
 0x2e1   :  { %3191 = vmatprep.subr.msk.mxu0 %vm470_vm5, %v2197_v37 }
 0x2e3   :  { %3181 = vmatmul.mubr.msk.f32.gmra.mrb[12].mxu0 %vm248_vm4, %v1966_v36 }
 0x2e4   :  { %3185 = vmatprep.mubr.msk.f32.mxu0 %vm248_vm4, %v2072_v40 }
 0x2e7   :  { %3186 = vmatmul.mubr.msk.f32.vlgmr.msra.gmra.mrb[10].mxu0 %vm248_vm4, %v2073_v44 }
 0x2e8   :  { %3192 = vmatpush3.msk.msra.mxu0 %vm470_vm5, %v2197_v37  ;;  %3188 = vmatprep.mubr.msk.f32.mxu0 %vm248_vm4, %v2074_v16 }
 0x2e9   :  { %3199 = vmatprep.subr.msk.mxu0 %vm470_vm5, %v2308_v53 }
 0x2eb   :  { %3189 = vmatmul.mubr.msk.f32.gmra.mrb[12].mxu0 %vm248_vm4, %v2075_v51 }
 0x2ec   :  { %3193 = vmatprep.mubr.msk.f32.mxu0 %vm248_vm4, %v2193_v52 }
 0x2ef   :  { %3194 = vmatmul.mubr.msk.f32.vlgmr.msra.gmra.mrb[10].mxu0 %vm248_vm4, %v2194_v30 }
 0x2f0   :  { %3200 = vmatpush3.msk.msra.mxu0 %vm470_vm5, %v2308_v53  ;;  %3196 = vmatprep.mubr.msk.f32.mxu0 %vm248_vm4, %v2195_v56 }
 0x2f1   :  { %3207 = vmatprep.subr.msk.mxu0 %vm470_vm5, %v2419_v15 }
 0x2f3   :  { %3197 = vmatmul.mubr.msk.f32.gmra.mrb[12].mxu0 %vm248_vm4, %v2196_v1 }
 0x2f4   :  { %3201 = vmatprep.mubr.msk.f32.mxu0 %vm248_vm4, %v2304_v8 }
 0x2f7   :  { %3202 = vmatmul.mubr.msk.f32.vlgmr.msra.gmra.mrb[10].mxu0 %vm248_vm4, %v2305_v34 }
 0x2f8   :  { %3208 = vmatpush3.msk.msra.mxu0 %vm470_vm5, %v2419_v15  ;;  %3204 = vmatprep.mubr.msk.f32.mxu0 %vm248_vm4, %v2306_v38  ;;  %v2936_v38 = vld [vmem:[%s4273_s4 + $0x4] ss:$0 sm:$0xff] }
 0x2f9   :  { %3215 = vmatprep.subr.msk.mxu0 %vm470_vm5, %v2530_v43 }
 0x2fb   :  { %3205 = vmatmul.mubr.msk.f32.gmra.mrb[12].mxu0 %vm248_vm4, %v2307_v12 }
 0x2fc   :  { %3209 = vmatprep.mubr.msk.f32.mxu0 %vm248_vm4, %v2415_v49  ;;  %v2937_v49 = vld [vmem:[%s4273_s4 + $0x5] ss:$0 sm:$0xff] }
 0x2ff   :  { %3210 = vmatmul.mubr.msk.f32.vlgmr.msra.gmra.mrb[10].mxu0 %vm248_vm4, %v2416_v19 }
 0x300   :  { %3216 = vmatpush3.msk.msra.mxu0 %vm470_vm5, %v2530_v43  ;;  %3212 = vmatprep.mubr.msk.f32.mxu0 %vm248_vm4, %v2417_v57 }
 0x303   :  { %3213 = vmatmul.mubr.msk.f32.gmra.mrb[12].mxu0 %vm248_vm4, %v2418_v58 }
 0x304   :  { %3217 = vmatprep.mubr.msk.f32.mxu0 %vm248_vm4, %v2526_v45 }
 0x307   :  { %3218 = vmatmul.mubr.msk.f32.vlgmr.msra.gmra.mrb[10].mxu0 %vm248_vm4, %v2527_v2 }
 0x308   :  { %3220 = vmatprep.mubr.msk.f32.mxu0 %vm248_vm4, %v2528_v63 }
 0x30b   :  { %3221 = vmatmul.mubr.msk.f32.gmra.mrb[12].mxu0 %vm248_vm4, %v2529_v21 }
 0x3da   :  { %v3219_v9 = vpop.f32.mrb[10].mxu0 }
 0x3db   :  { %v2638_v27 = vsel %vm248_vm4, %v3219_v9, 0.0  ;;  %v2612_v47 = vpop.f32.mrb[11].mxu0 }
 0x3dc   :  { %v2637_v50 = vsel %vm248_vm4, %v2612_v47, 0.0 }
 0x3dd   :  { %v2639_v26 = vadd.f32 %v2638_v27, %v2637_v50 }
 0x3de   :  { %v3222_v10 = vpop.f32.mrb[12].mxu0 }
 0x3df   :  { %v2622_v20 = vpop.f32.mrb[13].mxu0  ;;  %v2642_v55 = vsel %vm248_vm4, %v3222_v10, 0.0 }
 0x3e0   :  { %v2640_v28 = vsel %vm248_vm4, %v2622_v20, 0.0 }
 0x3e1   :  { %v2641_v54 = vadd.f32 %v2640_v28, %v2639_v26 }
 0x3e3   :  { %v2643_v0 = vadd.f32 %v2642_v55, %v2641_v54 }
 0x3e5   :  { %v2644_v33 = vrot.slane %v2643_v0, 4 }
 0x3e7   :  { %v2645_v22 = vadd.f32 %v2644_v33, %v2643_v0 }
 0x3e9   :  { %v2646_v4 = vrot.slane %v2645_v22, 2 }
 0x3eb   :  { %v2647_v11 = vadd.f32 %v2646_v4, %v2645_v22 }
 0x3ed   :  { %v2648_v59 = vrot.slane %v2647_v11, 1 }
 0x3ef   :  { %v2649_v62 = vadd.f32 %v2648_v59, %v2647_v11 }
 0x3f1   :  { %v2650_v60 = vmul.f32 0.03125, %v2649_v62 }
 0x3f3   :  { %v2651_v41 = vsub.f32 %v2612_v47, %v2650_v60  ;;  %v2652_v48 = vsub.f32 %v3219_v9, %v2650_v60  ;;  %v2653_v23 = vsub.f32 %v2622_v20, %v2650_v60  ;;  %v2654_v3 = vsub.f32 %v3222_v10, %v2650_v60 }
 0x3f5   :  { %v2655_v35 = vmul.f32 %v2651_v41, %v2651_v41  ;;  %v2656_v7 = vmul.f32 %v2652_v48, %v2652_v48  ;;  %v2657_v31 = vmul.f32 %v2653_v23, %v2653_v23  ;;  %v2658_v29 = vmul.f32 %v2654_v3, %v2654_v3 }
 0x3f7   :  { %v2659_v39 = vsel %vm248_vm4, %v2655_v35, 0.0  ;;  %v2660_v37 = vsel %vm248_vm4, %v2656_v7, 0.0  ;;  %v2662_v40 = vsel %vm248_vm4, %v2657_v31, 0.0  ;;  %v2664_v16 = vsel %vm248_vm4, %v2658_v29, 0.0  ;;  %v2938_v35 = vld [vmem:[%s4275_s6] ss:$0 sm:$0xff] }
 0x3f8   :  { %v2661_v36 = vadd.f32 %v2660_v37, %v2659_v39 }
 0x3fa   :  { %v2663_v44 = vadd.f32 %v2662_v40, %v2661_v36 }
 0x3fc   :  { %v2665_v53 = vadd.f32 %v2664_v16, %v2663_v44 }
 0x3fe   :  { %v2666_v51 = vrot.slane %v2665_v53, 4 }
 0x400   :  { %v2667_v52 = vadd.f32 %v2666_v51, %v2665_v53 }
 0x402   :  { %v2668_v30 = vrot.slane %v2667_v52, 2 }
 0x404   :  { %v2669_v56 = vadd.f32 %v2668_v30, %v2667_v52 }
 0x406   :  { %v2670_v24 = vrot.slane %v2669_v56, 1 }
 0x408   :  { %v2671_v15 = vadd.f32 %v2670_v24, %v2669_v56 }
 0x40a   :  { %v2672_v1 = vmul.f32 0.03125, %v2671_v15 }
 0x40c   :  { %v2673_v8 = vadd.f32 1e-05, %v2672_v1 }
 0x40e   :  { %3308 = vrsqrt.f32 %v2673_v8 }
 0x418   :  { %v3309_v34 = vpop.eup %3308 }
 0x419   :  { %v2675_v32 = vmul.f32 %v3309_v34, %v2651_v41  ;;  %v2676_v5 = vmul.f32 %v3309_v34, %v2652_v48  ;;  %v2677_v43 = vmul.f32 %v3309_v34, %v2653_v23  ;;  %v2678_v12 = vmul.f32 %v3309_v34, %v2654_v3 }
 0x41b   :  { %v2683_v19 = vmul.f32 %v2936_v38, %v2675_v32  ;;  %v2684_v57 = vmul.f32 %v2936_v38, %v2676_v5  ;;  %v2685_v61 = vmul.f32 %v2936_v38, %v2677_v43  ;;  %v2686_v17 = vmul.f32 %v2936_v38, %v2678_v12 }
 0x41d   :  { %v2691_v58 = vadd.f32 %v2937_v49, %v2683_v19  ;;  %v2692_v45 = vadd.f32 %v2937_v49, %v2684_v57  ;;  %v2693_v2 = vadd.f32 %v2937_v49, %v2685_v61  ;;  %v2694_v63 = vadd.f32 %v2937_v49, %v2686_v17 }
 0x41f   :  { %v2695_v42 = vadd.f32 %v2691_v58, %v3596_v13  ;;  %v2696_v25 = vadd.f32 %v2692_v45, %v3598_v14  ;;  %v2697_v21 = vadd.f32 %v2693_v2, %v3600_v46  ;;  %v2698_v18 = vadd.f32 %v2694_v63, %v4286_v6 }
 0x421   :  { %v2699_v9 = vmax.f32 %v2695_v42, 0.0  ;;  %v2700_v27 = vmax.f32 %v2696_v25, 0.0  ;;  %v2701_v47 = vmax.f32 %v2697_v21, 0.0  ;;  %v2702_v50 = vmax.f32 %v2698_v18, 0.0 }
 0x423   :  { %v2703_v26 = vsel %vm248_vm4, %v2699_v9, 0.0  ;;  %v2704_v10 = vsel %vm248_vm4, %v2700_v27, 0.0  ;;  %v2714_v20 = vsel %vm248_vm4, %v2701_v47, 0.0  ;;  %v2715_v28 = vsel %vm248_vm4, %v2702_v50, 0.0 }
 0x424   :  { %v2716_v54 = vadd.f32 %v2715_v28, %v2714_v20  ;;  %v2705_v13 = vadd.f32 %v2704_v10, %v2703_v26 }
 0x426   :  { %v2717_v55 = vrot.slane %v2716_v54, 4  ;;  %v2706_v14 = vrot.slane %v2705_v13, 4 }
 0x428   :  { %v2718_v0 = vadd.f32 %v2717_v55, %v2716_v54  ;;  %v2707_v46 = vadd.f32 %v2706_v14, %v2705_v13 }
 0x42a   :  { %v2719_v33 = vrot.slane %v2718_v0, 2  ;;  %v2708_v22 = vrot.slane %v2707_v46, 2 }
 0x42c   :  { %v2709_v4 = vadd.f32 %v2708_v22, %v2707_v46  ;;  %v2720_v11 = vadd.f32 %v2719_v33, %v2718_v0 }
 0x42e   :  { %v2710_v59 = vrot.slane %v2709_v4, 1  ;;  %v2721_v62 = vrot.slane %v2720_v11, 1 }
 0x430   :  { %v2711_v60 = vadd.f32 %v2710_v59, %v2709_v4  ;;  %v2722_v41 = vadd.f32 %v2721_v62, %v2720_v11 }
 0x432   :  { %v2713_v48 = vmul.f32 0.0625, %v2711_v60  ;;  %v2723_v23 = vmul.f32 0.0625, %v2722_v41 }
 0x434   :  { %v2724_v3 = vsel %vm97_vm0, %v2713_v48, %v2723_v23 }
 0x435   :  { %3226 = vmatmul.mubr.msk.f32.vlgmr.msra.gmra.mrb[10].mxu1 %vm248_vm4, %v2724_v3 }
 0x508   :  { %v2805_v7 = vpop.f32.mrb[10].mxu1 }
 0x509   :  { %v2806_v31 = vadd.f32 %v2938_v35, %v2805_v7  ;;  %v3227_v29 = vpop.f32.mrb[11].mxu1 }
 0x50b   :  { %2810 = vst.msk [vmem:[#allocation2] sm:$0x3] %vm2809_vm10, %v2806_v31 }
 0x50c   :  { %3321 = shalt.err (!%p3318_p4)
}
 0x50d   :  { %s3322_s18 = scalar_lea.hbm %s4277_s8, 32 }
 0x50e   :  { %p3323_p5 = scmp.ne.s32.totalorder %s4277_s8, %s3322_s18  ;;  %p3326_p6 = scmp.lt.u32.totalorder %s3322_s18, %s4277_s8 }
 0x510   :  { %p3328_p7 = pnand %p3326_p6, %p3323_p5 }
 0x512   :  { %3331 = shalt.err (!%p3328_p7)
}
 0x513   :  { %2820 = dma.vmem_to_hbm [thread:$0]  %s2818_s16, 32, %s4277_s8, [#allocation3]  }
 0x514   :  { %3332 = dma.done.wait [#allocation3], 32  }
 0x515   :  { %3333 = vsyncadd [#allocation3], 4294967264 }
 0x516   :  { %2824 = vsyncpa [#allocation3], 1 }

</bundles_post_ra>
